<compile_context>
chip_gen: v5e
topology: v5e:2x2
jax: 0.10.0
libtpu: 0.0.40
codegen_flags: <defaults>
</compile_context>

<pallas_src>
import functools

import jax
import jax.numpy as jnp
from jax.experimental import pallas as pl
from jax.experimental.pallas import tpu as pltpu


def _round_up(x, m):
    return (x + m - 1) // m * m


# ----------------------------- fused kernel --------------------------------
def _unignn_kernel(x_ref, w_ref, b_ref, bmeanT_ref, binc_ref, out_ref,
                   xe_acc, xe_bf16, *, nn):
    t = pl.program_id(1)

    # Linear tile for the current row stripe: bf16 MXU operands, f32
    # accumulation, bias added in f32.  Needed by both phases.
    # (Padded X rows are zero so padded XW rows equal the bias; they only ever
    #  meet zero incidence columns/rows and are sliced off by the wrapper.)
    xw = jnp.dot(x_ref[...], w_ref[...], preferred_element_type=jnp.float32)
    xw = xw + b_ref[...]                       # [TN, TD] + [1, TD]

    @pl.when(t == 0)
    def _init():
        xe_acc[...] = jnp.zeros_like(xe_acc)

    @pl.when(t < nn)
    def _accumulate_xe():
        # Mean-normalized incidence (M_pad, TN) @ XW (TN, TD): plain jnp.dot,
        # no in-kernel transpose (B_mean^T is shipped pre-transposed, with
        # 1/count already folded in).
        xe_acc[...] += jnp.dot(bmeanT_ref[...], xw.astype(jnp.bfloat16),
                               preferred_element_type=jnp.float32)

    @pl.when(t == nn)
    def _cast_xe_once():
        # Single bf16 cast per d tile; resident across the whole phase 2.
        xe_bf16[...] = xe_acc[...].astype(jnp.bfloat16)

    @pl.when(t >= nn)
    def _emit_out():
        xv = jnp.dot(binc_ref[...], xe_bf16[...],
                     preferred_element_type=jnp.float32)
        out_ref[...] = (xw + xv).astype(out_ref.dtype)


# ------------------------------- wrapper ------------------------------------
@functools.partial(jax.jit,
                   static_argnames=("num_edges", "tile_n", "tile_d"))
def unignn_forward(X, W_t, b, vertex, edges, num_edges,
                   tile_n=256, tile_d=256):
    """X: [N, in_dim] f32, W_t: [in_dim, out_dim] f32 (pre-transposed Linear
    weight), b: [out_dim] f32, vertex/edges: [E] int32 incidence lists,
    num_edges = M (static)."""
    N, in_dim = X.shape
    out_dim = W_t.shape[1]
    M = num_edges

    # ---- static tile-size selection ----------------------------------------
    D128 = _round_up(out_dim, 128)
    TD = min(tile_d, D128)
    # Keep >= 2 output-column tiles when possible so the 'parallel' d axis can
    # shard across both v7x TensorCores (no effect on v5e/v6e, 1 TC).
    if D128 // TD < 2 and D128 >= 256:
        TD = max(128, (D128 // 2) // 128 * 128)
    TN = min(tile_n, _round_up(N, 128))

    N_pad = _round_up(N, TN)
    D_pad = _round_up(out_dim, TD)
    K_pad = _round_up(in_dim, 128)
    M_pad = _round_up(M, 128)
    nd, nn = D_pad // TD, N_pad // TN

    # ---- glue: incidence matrices via O(E) segment_sum scatters ------------
    # (For a static graph this block is hoistable out of the jit entirely.)
    ones = jnp.ones(vertex.shape, jnp.float32)
    vtx = vertex.astype(jnp.int32)
    edg = edges.astype(jnp.int32)
    flat = vtx * M_pad + edg
    binc_f32 = jax.ops.segment_sum(ones, flat, num_segments=N_pad * M_pad)
    binc_f32 = binc_f32.reshape(N_pad, M_pad)       # multiplicity of (n, m)
    counts = jax.ops.segment_sum(ones, edg, num_segments=M_pad)
    inv_counts = jnp.where(counts > 0, 1.0 / jnp.maximum(counts, 1.0), 0.0)

    # bf16 MXU operands.  NOTE: bf16 holds the (vertex, edge) multiplicities
    # exactly only up to 256 repeats of the same incidence pair.
    binc = binc_f32.astype(jnp.bfloat16)                              # [N_pad, M_pad]
    # 1/count folded into the transposed copy used for the Xe mean (drops a
    # separate inv_counts stream + finalize multiply; <=0.4% rel. error).
    bmeanT = (binc_f32.T * inv_counts[:, None]).astype(jnp.bfloat16)  # [M_pad, N_pad]

    x_pad = jnp.zeros((N_pad, K_pad), jnp.bfloat16).at[:N, :in_dim].set(
        X.astype(jnp.bfloat16))
    w_pad = jnp.zeros((K_pad, D_pad), jnp.bfloat16).at[:in_dim, :out_dim].set(
        W_t.astype(jnp.bfloat16))
    b_pad = jnp.zeros((1, D_pad), jnp.float32).at[0, :out_dim].set(
        b.astype(jnp.float32))

    # ---- cost estimate reflecting actual streaming -------------------------
    flops = 4 * N_pad * D_pad * (K_pad + M_pad)
    bytes_accessed = (2 * nd * N_pad * K_pad * 2     # X streamed in both phases, per d tile
                      + K_pad * D_pad * 2            # W (one column tile per d)
                      + D_pad * 4                    # bias
                      + nd * M_pad * N_pad * 2       # B_mean^T (phase 1, per d tile)
                      + nd * N_pad * M_pad * 2       # B        (phase 2, per d tile)
                      + N_pad * D_pad * 4)           # out

    kernel = functools.partial(_unignn_kernel, nn=nn)

    out = pl.pallas_call(
        kernel,
        out_shape=jax.ShapeDtypeStruct((N_pad, D_pad), jnp.float32),
        grid_spec=pltpu.PrefetchScalarGridSpec(
            num_scalar_prefetch=0,
            grid=(nd, 2 * nn),
            in_specs=[
                # X row stripe: advances through both phases (t mod nn).
                pl.BlockSpec((TN, K_pad), lambda d, t: (t % nn, 0)),
                pl.BlockSpec((K_pad, TD), lambda d, t: (0, d)),        # W
                pl.BlockSpec((1, TD), lambda d, t: (0, d)),            # bias
                # B_mean^T column stripe: advances in phase 1, parked (no
                # re-DMA) at its last block during phase 2.
                pl.BlockSpec((M_pad, TN),
                             lambda d, t: (0, jnp.minimum(t, nn - 1))),
                # B row stripe: parked at block 0 during phase 1 (prefetch for
                # phase 2), advances in phase 2.
                pl.BlockSpec((TN, M_pad),
                             lambda d, t: (jnp.maximum(t - nn, 0), 0)),
            ],
            # out block index is held constant through phase 1 (no writeback
            # of the unwritten buffer) and advances with phase 2.
            out_specs=pl.BlockSpec(
                (TN, TD), lambda d, t: (jnp.maximum(t - nn, 0), d)),
            scratch_shapes=[
                pltpu.VMEM((M_pad, TD), jnp.float32),    # Xe f32 accumulator
                pltpu.VMEM((M_pad, TD), jnp.bfloat16),   # Xe bf16 (cast once)
            ],
        ),
        compiler_params=pltpu.CompilerParams(
            dimension_semantics=("parallel", "arbitrary"),
            vmem_limit_bytes=64 * 1024 * 1024),
        cost_estimate=pl.CostEstimate(flops=flops, transcendentals=0,
                                      bytes_accessed=bytes_accessed),
    )(x_pad, w_pad, b_pad, bmeanT, binc)

    return out[:N, :out_dim]


# ------------------------------ reference -----------------------------------
def unignn_reference(X, W_t, b, vertex, edges, num_edges):
    """Pure-JAX f32 reference mirroring torch_scatter semantics."""
    N = X.shape[0]
    M = num_edges
    XW = X @ W_t + b[None, :]
    Xve = XW[vertex]                                               # [E, out]
    counts = jax.ops.segment_sum(jnp.ones_like(edges, jnp.float32), edges, M)
    Xe = jax.ops.segment_sum(Xve, edges, M) / jnp.maximum(counts, 1.0)[:, None]
    Xev = Xe[edges]                                                # [E, out]
    Xv = jax.ops.segment_sum(Xev, vertex, N)                       # [N, out]
    return XW + Xv


if __name__ == "__main__":
    key = jax.random.PRNGKey(0)
    k_x, k_w, k_b, k_v, k_e = jax.random.split(key, 5)

    # Small but multi-tile shapes: N nodes, E incidences, M hyperedges.
    N, in_dim, out_dim = 300, 48, 160
    E, M = 900, 70

    X = jax.random.normal(k_x, (N, in_dim), dtype=jnp.float32)
    # PyTorch Linear stores weight as [out, in]; kernel takes the transpose.
    W = jax.random.normal(k_w, (out_dim, in_dim), dtype=jnp.float32) * 0.1
    b = jax.random.normal(k_b, (out_dim,), dtype=jnp.float32) * 0.1
    W_t = W.T

    vertex = jax.random.randint(k_v, (E,), 0, N, dtype=jnp.int32)
    edges = jax.random.randint(k_e, (E,), 0, M, dtype=jnp.int32)

    out = unignn_forward(X, W_t, b, vertex, edges, num_edges=M)
    out = jax.block_until_ready(out)

    ref = unignn_reference(X, W_t, b, vertex, edges, M)
    assert out.shape == (N, out_dim)
    # bf16 MXU operands with f32 accumulation -> loosened tolerance.
    assert jnp.allclose(out, ref, atol=5e-2, rtol=5e-2), "mismatch vs reference"

    print("KERNEL_OK")
</pallas_src>

<mosaic_0001>
module attributes {stable_mosaic.version = 11 : i64} {
  func.func @_unignn_kernel(%arg0: i32, %arg1: i32, %arg2: memref<256x128xbf16, #tpu.memory_space<vmem>>, %arg3: memref<128x128xbf16, #tpu.memory_space<vmem>>, %arg4: memref<1x128xf32, #tpu.memory_space<vmem>>, %arg5: memref<128x256xbf16, #tpu.memory_space<vmem>>, %arg6: memref<256x128xbf16, #tpu.memory_space<vmem>>, %arg7: memref<256x128xf32, #tpu.memory_space<vmem>>, %arg8: memref<128x128xf32, #tpu.memory_space<vmem>>, %arg9: memref<128x128xbf16, #tpu.memory_space<vmem>>) attributes {dimension_semantics = [#tpu.dimension_semantics<parallel>, #tpu.dimension_semantics<arbitrary>], iteration_bounds = array<i64: 2, 4>, scalar_prefetch = 0 : i64, scratch_operands = 2 : i64, tpu.core_type = #tpu.core_type<tc>, window_params = [{transform_indices = @transform_0, window_bounds = array<i64: 256, 128>}, {transform_indices = @transform_1, window_bounds = array<i64: 128, 128>}, {transform_indices = @transform_2, window_bounds = array<i64: 1, 128>}, {transform_indices = @transform_3, window_bounds = array<i64: 128, 256>}, {transform_indices = @transform_4, window_bounds = array<i64: 256, 128>}, {transform_indices = @transform_5, window_bounds = array<i64: 256, 128>}]} {
    %c0 = arith.constant 0 : index
    %c0_0 = arith.constant 0 : index
    %0 = vector.load %arg2[%c0, %c0_0] : memref<256x128xbf16, #tpu.memory_space<vmem>>, vector<256x128xbf16>
    %c0_1 = arith.constant 0 : index
    %c0_2 = arith.constant 0 : index
    %1 = vector.load %arg3[%c0_1, %c0_2] : memref<128x128xbf16, #tpu.memory_space<vmem>>, vector<128x128xbf16>
    %cst = arith.constant dense<0.000000e+00> : vector<256x128xf32>
    %2 = tpu.matmul %0, %1, %cst {dimension_numbers = #tpu.dot_dimension_numbers<[1], [0], [0], [1], [0, 0, 1, 1], [], []>} : vector<256x128xbf16>, vector<128x128xbf16>, vector<256x128xf32> -> vector<256x128xf32>
    %c0_3 = arith.constant 0 : index
    %c0_4 = arith.constant 0 : index
    %3 = vector.load %arg4[%c0_3, %c0_4] : memref<1x128xf32, #tpu.memory_space<vmem>>, vector<1x128xf32>
    %4 = vector.broadcast %3 : vector<1x128xf32> to vector<256x128xf32>
    %5 = arith.addf %2, %4 : vector<256x128xf32>
    %c0_i32 = arith.constant 0 : i32
    %6 = arith.cmpi eq, %arg1, %c0_i32 : i32
    %7 = arith.extui %6 : i1 to i32
    %c0_i32_5 = arith.constant 0 : i32
    %8 = arith.cmpi ne, %7, %c0_i32_5 : i32
    scf.if %8 {
      %cst_11 = arith.constant 0.000000e+00 : f32
      %18 = vector.broadcast %cst_11 : f32 to vector<128x128xf32>
      %c0_12 = arith.constant 0 : index
      %c0_13 = arith.constant 0 : index
      %19 = vector.load %arg8[%c0_12, %c0_13] : memref<128x128xf32, #tpu.memory_space<vmem>>, vector<128x128xf32>
      tpu.vector_store %arg8[%c0_12, %c0_13], %18 {strides = array<i32>} : memref<128x128xf32, #tpu.memory_space<vmem>>, vector<128x128xf32>,
    } else {
    }
    %c2_i32 = arith.constant 2 : i32
    %9 = arith.cmpi slt, %arg1, %c2_i32 : i32
    %10 = arith.extui %9 : i1 to i32
    %c0_i32_6 = arith.constant 0 : i32
    %11 = arith.cmpi ne, %10, %c0_i32_6 : i32
    scf.if %11 {
      %c0_11 = arith.constant 0 : index
      %c0_12 = arith.constant 0 : index
      %18 = vector.load %arg8[%c0_11, %c0_12] : memref<128x128xf32, #tpu.memory_space<vmem>>, vector<128x128xf32>
      %c0_13 = arith.constant 0 : index
      %c0_14 = arith.constant 0 : index
      %19 = vector.load %arg5[%c0_13, %c0_14] : memref<128x256xbf16, #tpu.memory_space<vmem>>, vector<128x256xbf16>
      %20 = arith.truncf %5 : vector<256x128xf32> to vector<256x128xbf16>
      %cst_15 = arith.constant dense<0.000000e+00> : vector<128x128xf32>
      %21 = tpu.matmul %19, %20, %cst_15 {dimension_numbers = #tpu.dot_dimension_numbers<[1], [0], [0], [1], [0, 0, 1, 1], [], []>} : vector<128x256xbf16>, vector<256x128xbf16>, vector<128x128xf32> -> vector<128x128xf32>
      %22 = arith.addf %18, %21 : vector<128x128xf32>
      %c0_16 = arith.constant 0 : index
      %c0_17 = arith.constant 0 : index
      %23 = vector.load %arg8[%c0_16, %c0_17] : memref<128x128xf32, #tpu.memory_space<vmem>>, vector<128x128xf32>
      tpu.vector_store %arg8[%c0_16, %c0_17], %22 {strides = array<i32>} : memref<128x128xf32, #tpu.memory_space<vmem>>, vector<128x128xf32>,
    } else {
    }
    %c2_i32_7 = arith.constant 2 : i32
    %12 = arith.cmpi eq, %arg1, %c2_i32_7 : i32
    %13 = arith.extui %12 : i1 to i32
    %c0_i32_8 = arith.constant 0 : i32
    %14 = arith.cmpi ne, %13, %c0_i32_8 : i32
    scf.if %14 {
      %c0_11 = arith.constant 0 : index
      %c0_12 = arith.constant 0 : index
      %18 = vector.load %arg8[%c0_11, %c0_12] : memref<128x128xf32, #tpu.memory_space<vmem>>, vector<128x128xf32>
      %19 = arith.truncf %18 : vector<128x128xf32> to vector<128x128xbf16>
      %c0_13 = arith.constant 0 : index
      %c0_14 = arith.constant 0 : index
      %20 = vector.load %arg9[%c0_13, %c0_14] : memref<128x128xbf16, #tpu.memory_space<vmem>>, vector<128x128xbf16>
      tpu.vector_store %arg9[%c0_13, %c0_14], %19 {strides = array<i32>} : memref<128x128xbf16, #tpu.memory_space<vmem>>, vector<128x128xbf16>,
    } else {
    }
    %c2_i32_9 = arith.constant 2 : i32
    %15 = arith.cmpi sge, %arg1, %c2_i32_9 : i32
    %16 = arith.extui %15 : i1 to i32
    %c0_i32_10 = arith.constant 0 : i32
    %17 = arith.cmpi ne, %16, %c0_i32_10 : i32
    scf.if %17 {
      %c0_11 = arith.constant 0 : index
      %c0_12 = arith.constant 0 : index
      %18 = vector.load %arg6[%c0_11, %c0_12] : memref<256x128xbf16, #tpu.memory_space<vmem>>, vector<256x128xbf16>
      %c0_13 = arith.constant 0 : index
      %c0_14 = arith.constant 0 : index
      %19 = vector.load %arg9[%c0_13, %c0_14] : memref<128x128xbf16, #tpu.memory_space<vmem>>, vector<128x128xbf16>
      %cst_15 = arith.constant dense<0.000000e+00> : vector<256x128xf32>
      %20 = tpu.matmul %18, %19, %cst_15 {dimension_numbers = #tpu.dot_dimension_numbers<[1], [0], [0], [1], [0, 0, 1, 1], [], []>} : vector<256x128xbf16>, vector<128x128xbf16>, vector<256x128xf32> -> vector<256x128xf32>
      %21 = arith.addf %5, %20 : vector<256x128xf32>
      %c0_16 = arith.constant 0 : index
      %c0_17 = arith.constant 0 : index
      %22 = vector.load %arg7[%c0_16, %c0_17] : memref<256x128xf32, #tpu.memory_space<vmem>>, vector<256x128xf32>
      tpu.vector_store %arg7[%c0_16, %c0_17], %21 {strides = array<i32>} : memref<256x128xf32, #tpu.memory_space<vmem>>, vector<256x128xf32>,
    } else {
    }
    return
  }
  func.func @transform_0(%arg0: i32, %arg1: i32) -> (i32, i32) {
    %c2_i32 = arith.constant 2 : i32
    %c0_i32 = arith.constant 0 : i32
    %0 = arith.cmpi eq, %c2_i32, %c0_i32 : i32
    %c1_i32 = arith.constant 1 : i32
    %1 = arith.select %0, %c1_i32, %c2_i32 : i32
    %2 = arith.remsi %arg1, %1 : i32
    %c0_i32_0 = arith.constant 0 : i32
    %3 = arith.cmpi ne, %2, %c0_i32_0 : i32
    %c0_i32_1 = arith.constant 0 : i32
    %4 = arith.cmpi slt, %2, %c0_i32_1 : i32
    %c0_i32_2 = arith.constant 0 : i32
    %5 = arith.cmpi slt, %1, %c0_i32_2 : i32
    %6 = arith.xori %4, %5 : i1
    %7 = arith.andi %6, %3 : i1
    %8 = arith.addi %2, %1 : i32
    %9 = arith.select %7, %8, %2 : i32
    %c0_i32_3 = arith.constant 0 : i32
    %c0_i32_4 = arith.constant 0 : i32
    return %9, %c0_i32_3 : i32, i32
  }
  func.func @transform_1(%arg0: i32, %arg1: i32) -> (i32, i32) {
    %c0_i32 = arith.constant 0 : i32
    %c0_i32_0 = arith.constant 0 : i32
    return %c0_i32, %arg0 : i32, i32
  }
  func.func @transform_2(%arg0: i32, %arg1: i32) -> (i32, i32) {
    %c0_i32 = arith.constant 0 : i32
    %c0_i32_0 = arith.constant 0 : i32
    return %c0_i32, %arg0 : i32, i32
  }
  func.func @transform_3(%arg0: i32, %arg1: i32) -> (i32, i32) {
    %c1_i32 = arith.constant 1 : i32
    %0 = arith.minsi %arg1, %c1_i32 : i32
    %c0_i32 = arith.constant 0 : i32
    %c0_i32_0 = arith.constant 0 : i32
    return %c0_i32, %0 : i32, i32
  }
  func.func @transform_4(%arg0: i32, %arg1: i32) -> (i32, i32) {
    %c2_i32 = arith.constant 2 : i32
    %0 = arith.subi %arg1, %c2_i32 : i32
    %c0_i32 = arith.constant 0 : i32
    %1 = arith.maxsi %0, %c0_i32 : i32
    %c0_i32_0 = arith.constant 0 : i32
    %c0_i32_1 = arith.constant 0 : i32
    return %1, %c0_i32_0 : i32, i32
  }
  func.func @transform_5(%arg0: i32, %arg1: i32) -> (i32, i32) {
    %c2_i32 = arith.constant 2 : i32
    %0 = arith.subi %arg1, %c2_i32 : i32
    %c0_i32 = arith.constant 0 : i32
    %1 = arith.maxsi %0, %c0_i32 : i32
    %c0_i32_0 = arith.constant 0 : i32
    return %1, %arg0 : i32, i32
  }
}

</mosaic_0001>

<bundles_post_ra>
// kernel: unignn_forward.1
= control target key start
LH: loop header
LB: loop body
LE: loop exit
PB: predicated region body
PF: predicated region fallthrough
CT: control target
= control target key end

     0   :  { %s3162_s0 = inlined_call_operand.vmem [shape: bf16[512,128], index: 0, kind: input, shape index: {}]   ;;  %s3163_s1 = inlined_call_operand.vmem [shape: bf16[128,256], index: 1, kind: input, shape index: {}]   ;;  %s3164_s2 = inlined_call_operand.vmem [shape: f32[1,256], index: 2, kind: input, shape index: {}]   ;;  %s3165_s3 = inlined_call_operand.vmem [shape: bf16[128,512], index: 3, kind: input, shape index: {}]   ;;  %s3166_s4 = inlined_call_operand.vmem [shape: bf16[512,128], index: 4, kind: input, shape index: {}]   ;;  %s3167_s5 = inlined_call_operand.vmem [shape: f32[512,256], index: 5, kind: output, shape index: {}]  }
   0x1   :  { %3171 = sst [smem:[#allocation12_spill]] %s3167_s5 }
   0x2   :  { %s2579_s18 = smov 0   ;;  %s2581_s19 = smov 0  }
   0x3   :  { %s2583_s20 = smov 0   ;;  %s2585_s21 = smov 0  }
   0x4   :  { %s2587_s22 = smov 0   ;;  %s2589_s23 = smov 0  }
   0x5   :  { %s2591_s24 = smov 0   ;;  %s2593_s25 = smov 0  }
   0x6   :  { %s2595_s26 = smov 0   ;;  %s2597_s27 = smov 0  }
   0x7   :  { %s2599_s28 = smov 0  }
   0x8 LB: > { %3172 = sst [smem:[#allocation7_spill]] %s2538_s26  ;;  %s24_s29 = sadd.s32 1, %s2538_s26  ;;  %s2546_s28 = sphi %s2599_s28, %s15_s28   ;;  %s2542_s27 = sphi %s2597_s27, %s3193_s27   ;;  %s2538_s26 = sphi %s2595_s26, %s3184_s26   ;;  %s2534_s25 = sphi %s2593_s25, %s3192_s25   ;;  %s2530_s24 = sphi %s2591_s24, %s3183_s24   ;;  %s2526_s23 = sphi %s2589_s23, %s3191_s23   ;;  %s2522_s22 = sphi %s2587_s22, %s3190_s22   ;;  %s2518_s21 = sphi %s2585_s21, %s3189_s21   ;;  %s2514_s20 = sphi %s2583_s20, %s3188_s20   ;;  %s2510_s19 = sphi %s2581_s19, %s3187_s19   ;;  %s2506_s18 = sphi %s2579_s18, %s3186_s18  }
   0x9   : > { %p25_p0 = scmp.ge.s32.totalorder %s24_s29, 4  ;;  %s27_s30 = sadd.s32 1, %s2542_s27 }
   0xa   : > { %s84_s6 = sadd.s32 1, %s2526_s23  ;;  %p91_p1 = scmp.ne.s32.totalorder %s2526_s23, %s2522_s22 }
   0xb   : > { %s3195_s29 = smov (%p25_p0, %s24_s29), 0  ;;  %s3197_s30 = smov (!%p25_p0, %s27_s30), %s2542_s27 }
   0xc   : > { %3173 = sst [smem:[#allocation8_spill]] %s3195_s29  ;;  %p92_p2 = scmp.eq.s32.totalorder %s2546_s28, 0 }
   0xd   : > { %p133_p3 = scmp.lt.s32.totalorder %s2538_s26, 1  ;;  %p29_p4 = scmp.ge.s32.totalorder %s3197_s30, 2 }
   0xe   : > { %p135_p5 = scmp.lt.s32.totalorder %s3195_s29, 1  ;;  %p2647_p6 = por %p92_p2, %p91_p1 }
   0xf   : > { %s140_s8 = sadd.s32 1, %s2518_s21  ;;  %s3199_s30 = smov (%p29_p4, %s3197_s30), 0 }
  0x10   : > { %3175 = sst [smem:[#allocation9_spill]] %s3199_s30  ;;  %s81_s10 = ssub.s32 %s2542_s27, %s3199_s30 }
  0x11   : > { %s2655_s9 = scalar_select %p133_p3, %s2538_s26, 1 }
  0x12   : > { %p147_p7 = scmp.ne.s32.totalorder %s2518_s21, %s2514_s20  ;;  %p82_p8 = scmp.eq.s32.totalorder %s81_s10, 0 }
  0x13   : > { %s1905_s11 = sadd.s32 4294967294, %s2538_s26  ;;  %s1895_s16 = sadd.s32 4294967295, %s2546_s28  }
  0x14   : > { %s136_s12 = scalar_select %p135_p5, %s3195_s29, 1 }
  0x15   : > { %s2664_s13 = scalar_select %p82_p8, %s2526_s23, %s84_s6  }
  0x16   : > { %s137_s14 = ssub.s32 %s2655_s9, %s136_s12  ;;  %p2669_p9 = por %p147_p7, %p92_p2 }
  0x17   : > { %3176 = sst [smem:[#allocation10_spill]] %s2664_s13  ;;  %p138_p10 = scmp.eq.s32.totalorder %s137_s14, 0 }
  0x18   : > { %p196_p11 = scmp.gt.s32.totalorder %s1905_s11, 0  ;;  %s1906_s17 = sadd.s32 4294967294, %s3195_s29 }
  0x19   : > { %s2676_s5 = scalar_select %p138_p10, %s2518_s21, %s140_s8  }
  0x1a   : > { %s3201_s11 = smov (!%p196_p11, %s1905_s11), 0  ;;  %p199_p12 = scmp.gt.s32.totalorder %s1906_s17, 0 }
  0x1b   : > { %3178 = sst [smem:[#allocation11_spill]] %s2676_s5  ;;  %p216_p13 = scmp.ne.s32.totalorder %s2510_s19, %s2506_s18 }
  0x1c   : > { %p217_p0 = scmp.eq.s32.totalorder %s1895_s16, 7  ;;  %s3203_s17 = smov (!%p199_p12, %s1906_s17), 0 }
  0x1d   : > { %s201_s12 = ssub.s32 %s3201_s11, %s3203_s17  ;;  %s206_s26 = sadd.s32 1, %s2510_s19 }
  0x1e   : > { %p2680_p1 = por %p217_p0, %p216_p13  ;;  %s203_s30 = sor.u32 %s201_s12, %s81_s10 }
  0x1f   : > { %p204_p2 = scmp.eq.s32.totalorder %s203_s30, 0  ;;  %p1908_p3 = scmp.ge.s32.totalorder %s2546_s28, 8 }
  0x21   : > { %s2686_s13 = scalar_select %p204_p2, %s2510_s19, %s206_s26  }
  0x22   : > { %239 = sbr.rel (%p1908_p3) target bundleno = 79 (0x4f), region = 16 }
  0x27   : > { %275 = sbr.rel (!%p2647_p6) target bundleno = 59 (0x3b), region = 24  ;;  %s277_s8 = sand.u32 (%p2647_p6), 1, %s2526_s23  }
  0x28   : > { %s1910_s14 = sshll.u32 (%p2647_p6), %s2542_s27, 2  ;;  %s1909_s16 = sshll.u32 (%p2647_p6), %s277_s8, 6 }
  0x29   : > { %s2696_s11 = scalar_lea.vmem (%p2647_p6), %s3163_s1, %s1910_s14  ;;  %s279_s26 = scalar_lea.vmem (%p2647_p6), [#allocation4], %s1909_s16 }
  0x2a   : > { %v298_v0 = vld [vmem:[%s2696_s11] sm:$0xf] (%p2647_p6)  ;;  %v300_v1 = vld [vmem:[%s2696_s11 + $0x8] sm:$0xf] (%p2647_p6)  ;;  %v302_v2 = vld [vmem:[%s2696_s11 + $0x10] sm:$0xf] (%p2647_p6) }
  0x2b   : > { %299 = vst [vmem:[%s279_s26] sm:$0xf] (%p2647_p6), %v298_v0  ;;  %v304_v3 = vld [vmem:[%s2696_s11 + $0x18] sm:$0xf] (%p2647_p6)  ;;  %v306_v4 = vld [vmem:[%s2696_s11 + $0x20] sm:$0xf] (%p2647_p6) }
  0x2c   : > { %301 = vst [vmem:[%s279_s26 + $0x4] sm:$0xf] %v300_v1  ;;  %v308_v5 = vld [vmem:[%s2696_s11 + $0x28] sm:$0xf]  ;;  %v310_v6 = vld [vmem:[%s2696_s11 + $0x30] sm:$0xf] }
  0x2d   : > { %303 = vst [vmem:[%s279_s26 + $0x8] sm:$0xf] %v302_v2  ;;  %v312_v7 = vld [vmem:[%s2696_s11 + $0x38] sm:$0xf]  ;;  %v314_v8 = vld [vmem:[%s2696_s11 + $0x40] sm:$0xf] }
  0x2e   : > { %305 = vst [vmem:[%s279_s26 + $0xc] sm:$0xf] %v304_v3  ;;  %v316_v9 = vld [vmem:[%s2696_s11 + $0x48] sm:$0xf]  ;;  %v318_v10 = vld [vmem:[%s2696_s11 + $0x50] sm:$0xf] }
  0x2f   : > { %307 = vst [vmem:[%s279_s26 + $0x10] sm:$0xf] %v306_v4  ;;  %v320_v11 = vld [vmem:[%s2696_s11 + $0x58] sm:$0xf]  ;;  %v322_v12 = vld [vmem:[%s2696_s11 + $0x60] sm:$0xf] }
  0x30   : > { %309 = vst [vmem:[%s279_s26 + $0x14] sm:$0xf] %v308_v5  ;;  %v324_v13 = vld [vmem:[%s2696_s11 + $0x68] sm:$0xf]  ;;  %v326_v14 = vld [vmem:[%s2696_s11 + $0x70] sm:$0xf] }
  0x31   : > { %311 = vst [vmem:[%s279_s26 + $0x18] sm:$0xf] %v310_v6  ;;  %v328_v15 = vld [vmem:[%s2696_s11 + $0x78] sm:$0xf] }
  0x32   : > { %313 = vst [vmem:[%s279_s26 + $0x1c] sm:$0xf] %v312_v7 }
  0x33   : > { %315 = vst [vmem:[%s279_s26 + $0x20] sm:$0xf] %v314_v8 }
  0x34   : > { %317 = vst [vmem:[%s279_s26 + $0x24] sm:$0xf] %v316_v9 }
  0x35   : > { %319 = vst [vmem:[%s279_s26 + $0x28] sm:$0xf] %v318_v10 }
  0x36   : > { %321 = vst [vmem:[%s279_s26 + $0x2c] sm:$0xf] %v320_v11 }
  0x37   : > { %323 = vst [vmem:[%s279_s26 + $0x30] sm:$0xf] %v322_v12 }
  0x38   : > { %325 = vst [vmem:[%s279_s26 + $0x34] sm:$0xf] %v324_v13 }
  0x39   : > { %327 = vst [vmem:[%s279_s26 + $0x38] sm:$0xf] %v326_v14 }
  0x3a   : > { %329 = vst [vmem:[%s279_s26 + $0x3c] sm:$0xf] %v328_v15 }
  0x3b PF: > { %391 = sbr.rel (!%p2669_p9) target bundleno = 79 (0x4f), region = 69  ;;  %s393_s5 = sand.u32 (%p2669_p9), 1, %s2518_s21  }
  0x3c   : > { %s2193_s29 = sshll.u32 (%p2669_p9), %s2655_s9, 3  ;;  %s1911_s30 = sshll.u32 (%p2669_p9), %s393_s5, 7 }
  0x3d   : > { %s2721_s17 = scalar_lea.vmem (%p2669_p9), %s3165_s3, %s2193_s29  ;;  %s395_s9 = scalar_lea.vmem (%p2669_p9), [#allocation5], %s1911_s30 }
  0x3e   : > { %v459_v16 = vld [vmem:[%s2721_s17] sm:$0xff] (%p2669_p9)  ;;  %v461_v17 = vld [vmem:[%s2721_s17 + $0x10] sm:$0xff] (%p2669_p9) }
  0x3f   : > { %v463_v18 = vld [vmem:[%s2721_s17 + $0x20] sm:$0xff] (%p2669_p9)  ;;  %460 = vst [vmem:[%s395_s9] sm:$0xff] (%p2669_p9), %v459_v16  ;;  %v465_v19 = vld [vmem:[%s2721_s17 + $0x30] sm:$0xff] (%p2669_p9) }
  0x40   : > { %462 = vst [vmem:[%s395_s9 + $0x8] sm:$0xff] %v461_v17  ;;  %v467_v20 = vld [vmem:[%s2721_s17 + $0x40] sm:$0xff]  ;;  %v469_v21 = vld [vmem:[%s2721_s17 + $0x50] sm:$0xff] }
  0x41   : > { %464 = vst [vmem:[%s395_s9 + $0x10] sm:$0xff] %v463_v18  ;;  %v471_v22 = vld [vmem:[%s2721_s17 + $0x60] sm:$0xff]  ;;  %v473_v23 = vld [vmem:[%s2721_s17 + $0x70] sm:$0xff] }
  0x42   : > { %466 = vst [vmem:[%s395_s9 + $0x18] sm:$0xff] %v465_v19  ;;  %v475_v24 = vld [vmem:[%s2721_s17 + $0x80] sm:$0xff]  ;;  %v477_v25 = vld [vmem:[%s2721_s17 + $0x90] sm:$0xff] }
  0x43   : > { %468 = vst [vmem:[%s395_s9 + $0x20] sm:$0xff] %v467_v20  ;;  %v479_v26 = vld [vmem:[%s2721_s17 + $0xa0] sm:$0xff]  ;;  %v481_v27 = vld [vmem:[%s2721_s17 + $0xb0] sm:$0xff] }
  0x44   : > { %470 = vst [vmem:[%s395_s9 + $0x28] sm:$0xff] %v469_v21  ;;  %v483_v28 = vld [vmem:[%s2721_s17 + $0xc0] sm:$0xff]  ;;  %v485_v29 = vld [vmem:[%s2721_s17 + $0xd0] sm:$0xff] }
  0x45   : > { %472 = vst [vmem:[%s395_s9 + $0x30] sm:$0xff] %v471_v22  ;;  %v487_v30 = vld [vmem:[%s2721_s17 + $0xe0] sm:$0xff]  ;;  %v489_v31 = vld [vmem:[%s2721_s17 + $0xf0] sm:$0xff] }
  0x46   : > { %474 = vst [vmem:[%s395_s9 + $0x38] sm:$0xff] %v473_v23 }
  0x47   : > { %476 = vst [vmem:[%s395_s9 + $0x40] sm:$0xff] %v475_v24 }
  0x48   : > { %478 = vst [vmem:[%s395_s9 + $0x48] sm:$0xff] %v477_v25 }
  0x49   : > { %480 = vst [vmem:[%s395_s9 + $0x50] sm:$0xff] %v479_v26 }
  0x4a   : > { %482 = vst [vmem:[%s395_s9 + $0x58] sm:$0xff] %v481_v27 }
  0x4b   : > { %484 = vst [vmem:[%s395_s9 + $0x60] sm:$0xff] %v483_v28 }
  0x4c   : > { %486 = vst [vmem:[%s395_s9 + $0x68] sm:$0xff] %v485_v29 }
  0x4d   : > { %488 = vst [vmem:[%s395_s9 + $0x70] sm:$0xff] %v487_v30 }
  0x4e   : > { %490 = vst [vmem:[%s395_s9 + $0x78] sm:$0xff] %v489_v31 }
  0x4f PF: > { %p1914_p4 = scmp.ge.s32.totalorder %s2546_s28, 1  ;;  %p510_p5 = scmp.lt.s32.totalorder %s2546_s28, 9 }
  0x51   : > { %p511_p6 = pnand %p1914_p4, %p510_p5 }
  0x52   : > { %s517_s15 = sand.u32 (!%p511_p6), 1, %s2522_s22   ;;  %s524_s12 = sand.u32 (!%p511_p6), 1, %s2514_s20  }
  0x53   : > { %514 = sbr.rel (%p511_p6) target bundleno = 851 (0x353), region = 111  ;;  %s1915_s8 = sshll.u32 (!%p511_p6), %s517_s15, 6 }
  0x54   : > { %s2743_s14 = sshll.u32 (!%p511_p6), %s524_s12, 7  ;;  %s579_s16 = sand.u32 (!%p511_p6), 1, %s2506_s18  }
  0x55   : > { %s1923_s11 = sadd.s32 (!%p511_p6), 4294967294, %s2530_s24  ;;  %s2747_s26 = scalar_lea.vmem (!%p511_p6), [#allocation4], %s1915_s8 }
  0x56   : > { %s2750_s5 = sshll.u32 (!%p511_p6), %s579_s16, 8  ;;  %p619_p7 = scmp.gt.s32.totalorder (!%p511_p6), %s1923_s11, 0 }
  0x57   : > { %p582_p8 = scmp.lt.s32.totalorder (!%p511_p6), %s2530_s24, 0  ;;  %s583_s18 = ssub.s32 (!%p511_p6), 0, %s2530_s24 }
  0x58   : > { %v2217_v32 = vld [vmem:[%s2747_s26 + $0x38] sm:$0xff]  ;;  %v2216_v33 = vld [vmem:[%s2747_s26 + $0x30] sm:$0xff]  ;;  %s3205_s11 = smov (!%p619_p7, %s1923_s11), 0  ;;  %s1918_s22 = smin.u32 %s2530_s24, %s583_s18  ;;  %v2215_v34 = vld [vmem:[%s2747_s26 + $0x28] sm:$0xff] }
  0x59   : > { %830 = vmatpush.bf16.msra.mxu0 %v2217_v32  ;;  %2306 = vmatpush.bf16.msra.mxu1 %v2217_v32  ;;  %s1924_s20 = sshll.u32 %s3205_s11, 5  ;;  %s585_s29 = sand.u32 1, %s1918_s22   ;;  %v2214_v35 = vld [vmem:[%s2747_s26 + $0x20] sm:$0xff]  ;;  %v2213_v36 = vld [vmem:[%s2747_s26 + $0x18] sm:$0xff]  ;;  %v2212_v37 = vld [vmem:[%s2747_s26 + $0x10] sm:$0xff] }
  0x5a   : > { %2307 = vmatpush.bf16.msra.mxu2 %v2217_v32  ;;  %2308 = vmatpush.bf16.msra.mxu3 %v2217_v32  ;;  %p622_p9 = scmp.lt.s32.totalorder %s1924_s20, 63  ;;  %s586_s30 = ssub.s32 0, %s585_s29  ;;  %v2211_v38 = vld [vmem:[%s2747_s26 + $0x8] sm:$0xff]  ;;  %v2210_v39 = vld [vmem:[%s2747_s26] sm:$0xff] }
  0x5b   : > { %s3209_s30 = smov (!%p582_p8, %s586_s30), %s585_s29  ;;  %p612_p10 = scmp.lt.s32.totalorder %s2534_s25, 1 }
  0x5c   : > { %s3207_s20 = smov (!%p622_p9, %s1924_s20), 63  ;;  %p1920_p11 = scmp.lt.s32.totalorder %s3209_s30, 0 }
  0x5d   : > { %831 = vmatpush.bf16.msra.mxu0 %v2216_v33  ;;  %2309 = vmatpush.bf16.msra.mxu1 %v2216_v33  ;;  %s1925_s7 = sshll.u32 %s3207_s20, 2  ;;  %s592_s15 = sadd.s32 2, %s3209_s30 }
  0x5e   : > { %2310 = vmatpush.bf16.msra.mxu2 %v2216_v33  ;;  %2311 = vmatpush.bf16.msra.mxu3 %v2216_v33  ;;  %s2765_s9 = scalar_lea.vmem %s3166_s4, %s1925_s7  ;;  %s3211_s15 = smov (!%p1920_p11, %s592_s15), %s3209_s30 }
  0x5f   : > { %s2769_s12 = scalar_select %p612_p10, %s2534_s25, 1 }
  0x60   : > { %s1921_s8 = sshll.u32 %s3211_s15, 5  ;;  %s2903_s17 = scalar_lea.vmem [#allocation5], %s2743_s14 }
  0x61   : > { %832 = vmatpush.bf16.msra.mxu0 %v2215_v34  ;;  %2312 = vmatpush.bf16.msra.mxu1 %v2215_v34  ;;  %p595_p12 = scmp.lt.s32.totalorder %s1921_s8, 63  ;;  %s614_s20 = scalar_lea.vmem %s3164_s2, %s2769_s12 }
  0x62   : > { %2313 = vmatpush.bf16.msra.mxu2 %v2215_v34  ;;  %2314 = vmatpush.bf16.msra.mxu3 %v2215_v34  ;;  %v2804_v56 = vld [vmem:[%s614_s20] ss:$0 sm:$0xff]  ;;  %s2906_s15 = scalar_lea.vmem [#allocation6], %s2750_s5  ;;  %p2022_p13 = scmp.ne.s32.totalorder %s2530_s24, 0 }
  0x63   : > { %s3213_s8 = smov (!%p595_p12, %s1921_s8), 63 }
  0x64   : > { %s1922_s22 = sshll.u32 %s3213_s8, 2 }
  0x65   : > { %833 = vmatpush.bf16.msra.mxu0 %v2214_v35  ;;  %2315 = vmatpush.bf16.msra.mxu1 %v2214_v35  ;;  %s2781_s7 = scalar_lea.vmem %s3162_s0, %s1922_s22 }
  0x66   : > { %2316 = vmatpush.bf16.msra.mxu2 %v2214_v35  ;;  %2317 = vmatpush.bf16.msra.mxu3 %v2214_v35  ;;  %v2194_v40 = vld [vmem:[%s2781_s7] sm:$0xff]  ;;  %v2195_v44 = vld [vmem:[%s2781_s7 + $0x8] sm:$0xff]  ;;  %v2196_v48 = vld [vmem:[%s2781_s7 + $0x10] sm:$0xff] }
  0x67   : > { %v2198_v41 = vld [vmem:[%s2781_s7 + $0x20] sm:$0xff]  ;;  %v2199_v45 = vld [vmem:[%s2781_s7 + $0x28] sm:$0xff]  ;;  %v2200_v49 = vld [vmem:[%s2781_s7 + $0x30] sm:$0xff] }
  0x68   : > { %v2202_v42 = vld [vmem:[%s2781_s7 + $0x40] sm:$0xff]  ;;  %v2203_v46 = vld [vmem:[%s2781_s7 + $0x48] sm:$0xff]  ;;  %v2204_v50 = vld [vmem:[%s2781_s7 + $0x50] sm:$0xff] }
  0x69   : > { %834 = vmatpush.bf16.msra.mxu0 %v2213_v36  ;;  %2318 = vmatpush.bf16.msra.mxu1 %v2213_v36  ;;  %v2206_v43 = vld [vmem:[%s2781_s7 + $0x60] sm:$0xff]  ;;  %v2207_v47 = vld [vmem:[%s2781_s7 + $0x68] sm:$0xff]  ;;  %v2208_v51 = vld [vmem:[%s2781_s7 + $0x70] sm:$0xff] }
  0x6a   : > { %2319 = vmatpush.bf16.msra.mxu2 %v2213_v36  ;;  %2320 = vmatpush.bf16.msra.mxu3 %v2213_v36  ;;  %v2197_v52 = vld [vmem:[%s2781_s7 + $0x18] sm:$0xff] }
  0x6b   : > { %v2201_v53 = vld [vmem:[%s2781_s7 + $0x38] sm:$0xff] }
  0x6c   : > { %v2205_v54 = vld [vmem:[%s2781_s7 + $0x58] sm:$0xff] }
  0x6d   : > { %835 = vmatpush.bf16.msra.mxu0 %v2212_v37  ;;  %2321 = vmatpush.bf16.msra.mxu1 %v2212_v37  ;;  %v2209_v55 = vld [vmem:[%s2781_s7 + $0x78] sm:$0xff] }
  0x6e   : > { %2322 = vmatpush.bf16.msra.mxu2 %v2212_v37  ;;  %2323 = vmatpush.bf16.msra.mxu3 %v2212_v37 }
  0x71   : > { %836 = vmatpush.bf16.msra.mxu0 %v2211_v38  ;;  %2324 = vmatpush.bf16.msra.mxu1 %v2211_v38 }
  0x72   : > { %2325 = vmatpush.bf16.msra.mxu2 %v2211_v38  ;;  %2326 = vmatpush.bf16.msra.mxu3 %v2211_v38 }
  0x75   : > { %837 = vmatpush.bf16.msra.mxu0 %v2210_v39  ;;  %2327 = vmatpush.bf16.msra.mxu1 %v2210_v39 }
  0x76   : > { %2328 = vmatpush.bf16.msra.mxu2 %v2210_v39  ;;  %2329 = vmatpush.bf16.msra.mxu3 %v2210_v39 }
  0x78   : > { %838 = vmatmul.bf16.vlgmr.msra.gmra.mxu0 %v2194_v40  ;;  %858 = vmatmul.bf16.vlgmr.msra.gmra.mxu1 %v2198_v41 }
  0x79   : > { %878 = vmatmul.bf16.vlgmr.msra.gmra.mxu2 %v2202_v42  ;;  %898 = vmatmul.bf16.vlgmr.msra.gmra.mxu3 %v2206_v43 }
  0x88   : > { %843 = vmatmul.bf16.gmra.mxu0 %v2195_v44  ;;  %863 = vmatmul.bf16.gmra.mxu1 %v2199_v45 }
  0x89   : > { %883 = vmatmul.bf16.gmra.mxu2 %v2203_v46  ;;  %903 = vmatmul.bf16.gmra.mxu3 %v2207_v47 }
  0x98   : > { %848 = vmatmul.bf16.gmra.mxu0 %v2196_v48  ;;  %868 = vmatmul.bf16.gmra.mxu1 %v2200_v49 }
  0x99   : > { %888 = vmatmul.bf16.gmra.mxu2 %v2204_v50  ;;  %908 = vmatmul.bf16.gmra.mxu3 %v2208_v51 }
  0xa8   : > { %853 = vmatmul.bf16.gmra.mxu0 %v2197_v52  ;;  %873 = vmatmul.bf16.gmra.mxu1 %v2201_v53 }
  0xa9   : > { %893 = vmatmul.bf16.gmra.mxu2 %v2205_v54  ;;  %913 = vmatmul.bf16.gmra.mxu3 %v2209_v55 }
  0xf5   : > { %v839_v57 = vpop.f32.mrf.mxu0  ;;  %v859_v58 = vpop.f32.mrf.mxu1 }
  0xf6   : > { %v2807_v59 = vadd.f32 %v2804_v56, %v839_v57  ;;  %v2810_v60 = vadd.f32 %v2804_v56, %v859_v58 }
  0xfc   : > { %v879_v61 = vpop.f32.mrf.mxu2  ;;  %v899_v62 = vpop.f32.mrf.mxu3 }
  0xfd   : > { %v2813_v63 = vadd.f32 %v2804_v56, %v879_v61  ;;  %v2816_v0 = vadd.f32 %v2804_v56, %v899_v62  ;;  %v841_v1 = vpop.f32.mrf.mxu0  ;;  %v861_v2 = vpop.f32.mrf.mxu1 }
  0xfe   : > { %v2819_v3 = vadd.f32 %v2804_v56, %v841_v1  ;;  %v2822_v4 = vadd.f32 %v2804_v56, %v861_v2 }
 0x104   : > { %v881_v5 = vpop.f32.mrf.mxu2  ;;  %v901_v6 = vpop.f32.mrf.mxu3 }
 0x105   : > { %v2825_v7 = vadd.f32 %v2804_v56, %v881_v5  ;;  %v2828_v8 = vadd.f32 %v2804_v56, %v901_v6  ;;  %v844_v9 = vpop.f32.mrf.mxu0  ;;  %v864_v10 = vpop.f32.mrf.mxu1 }
 0x106   : > { %v2831_v11 = vadd.f32 %v2804_v56, %v844_v9  ;;  %v2834_v12 = vadd.f32 %v2804_v56, %v864_v10 }
 0x10c   : > { %v884_v13 = vpop.f32.mrf.mxu2  ;;  %v904_v14 = vpop.f32.mrf.mxu3 }
 0x10d   : > { %v2837_v15 = vadd.f32 %v2804_v56, %v884_v13  ;;  %v2840_v16 = vadd.f32 %v2804_v56, %v904_v14  ;;  %v846_v17 = vpop.f32.mrf.mxu0  ;;  %v866_v18 = vpop.f32.mrf.mxu1 }
 0x10e   : > { %v2843_v19 = vadd.f32 %v2804_v56, %v846_v17  ;;  %v2846_v20 = vadd.f32 %v2804_v56, %v866_v18 }
 0x114   : > { %v886_v21 = vpop.f32.mrf.mxu2  ;;  %v906_v22 = vpop.f32.mrf.mxu3 }
 0x115   : > { %v2849_v23 = vadd.f32 %v2804_v56, %v886_v21  ;;  %v2852_v24 = vadd.f32 %v2804_v56, %v906_v22  ;;  %v849_v25 = vpop.f32.mrf.mxu0  ;;  %v869_v26 = vpop.f32.mrf.mxu1 }
 0x116   : > { %v2855_v27 = vadd.f32 %v2804_v56, %v849_v25  ;;  %v2858_v28 = vadd.f32 %v2804_v56, %v869_v26 }
 0x11c   : > { %v889_v29 = vpop.f32.mrf.mxu2  ;;  %v909_v30 = vpop.f32.mrf.mxu3 }
 0x11d   : > { %v2861_v31 = vadd.f32 %v2804_v56, %v889_v29  ;;  %v2864_v32 = vadd.f32 %v2804_v56, %v909_v30  ;;  %v851_v33 = vpop.f32.mrf.mxu0  ;;  %v871_v34 = vpop.f32.mrf.mxu1 }
 0x11e   : > { %v2867_v35 = vadd.f32 %v2804_v56, %v851_v33  ;;  %v2870_v36 = vadd.f32 %v2804_v56, %v871_v34 }
 0x124   : > { %v891_v37 = vpop.f32.mrf.mxu2  ;;  %v911_v38 = vpop.f32.mrf.mxu3 }
 0x125   : > { %v2873_v39 = vadd.f32 %v2804_v56, %v891_v37  ;;  %v2876_v40 = vadd.f32 %v2804_v56, %v911_v38  ;;  %v854_v41 = vpop.f32.mrf.mxu0  ;;  %v874_v42 = vpop.f32.mrf.mxu1 }
 0x126   : > { %v2879_v43 = vadd.f32 %v2804_v56, %v854_v41  ;;  %v2882_v44 = vadd.f32 %v2804_v56, %v874_v42 }
 0x12c   : > { %v894_v45 = vpop.f32.mrf.mxu2  ;;  %v914_v46 = vpop.f32.mrf.mxu3 }
 0x12d   : > { %v2885_v47 = vadd.f32 %v2804_v56, %v894_v45  ;;  %v2888_v48 = vadd.f32 %v2804_v56, %v914_v46  ;;  %v856_v49 = vpop.f32.mrf.mxu0  ;;  %v876_v50 = vpop.f32.mrf.mxu1 }
 0x12e   : > { %v2891_v51 = vadd.f32 %v2804_v56, %v856_v49  ;;  %v2894_v52 = vadd.f32 %v2804_v56, %v876_v50 }
 0x131   : > { %922 = sbr.rel (%p2022_p13) target bundleno = 327 (0x147), region = 123 }
 0x134   : > { %v896_v53 = vpop.f32.mrf.mxu2  ;;  %v916_v54 = vpop.f32.mrf.mxu3 }
 0x135   : > { %v2897_v55 = vadd.f32 %v2804_v56, %v896_v53  ;;  %v2900_v57 = vadd.f32 %v2804_v56, %v916_v54 }
 0x136   : > { %v2548_v58 = vmov 0.0  }
 0x137   : > { %923 = vst [vmem:[#allocation2 + $0x30] sm:$0xff] %v2548_v58 }
 0x138   : > { %924 = vst [vmem:[#allocation2] sm:$0xff] %v2548_v58 }
 0x139   : > { %925 = vst [vmem:[#allocation2 + $0x58] sm:$0xff] %v2548_v58 }
 0x13a   : > { %926 = vst [vmem:[#allocation2 + $0x18] sm:$0xff] %v2548_v58 }
 0x13b   : > { %927 = vst [vmem:[#allocation2 + $0x50] sm:$0xff] %v2548_v58 }
 0x13c   : > { %928 = vst [vmem:[#allocation2 + $0x68] sm:$0xff] %v2548_v58 }
 0x13d   : > { %929 = vst [vmem:[#allocation2 + $0x8] sm:$0xff] %v2548_v58 }
 0x13e   : > { %930 = vst [vmem:[#allocation2 + $0x48] sm:$0xff] %v2548_v58 }
 0x13f   : > { %931 = vst [vmem:[#allocation2 + $0x40] sm:$0xff] %v2548_v58 }
 0x140   : > { %932 = vst [vmem:[#allocation2 + $0x20] sm:$0xff] %v2548_v58 }
 0x141   : > { %933 = vst [vmem:[#allocation2 + $0x10] sm:$0xff] %v2548_v58 }
 0x142   : > { %934 = vst [vmem:[#allocation2 + $0x38] sm:$0xff] %v2548_v58 }
 0x143   : > { %935 = vst [vmem:[#allocation2 + $0x60] sm:$0xff] %v2548_v58 }
 0x144   : > { %936 = vst [vmem:[#allocation2 + $0x70] sm:$0xff] %v2548_v58 }
 0x145   : > { %937 = vst [vmem:[#allocation2 + $0x78] sm:$0xff] %v2548_v58 }
 0x146   : > { %938 = vst [vmem:[#allocation2 + $0x28] sm:$0xff] %v2548_v58 }
 0x147 PF: > { %p2023_p0 = scmp.ge.s32.totalorder %s2530_s24, 2 }
 0x149   : > { %942 = sbr.rel (%p2023_p0) target bundleno = 561 (0x231), region = 127 }
 0x14e   : > { %v982_v56 = vpack.c.bf16 %v2894_v52, %v2882_v44  ;;  %v990_v61 = vpack.c.bf16 %v2900_v57, %v2888_v48  ;;  %v981_v62 = vpack.c.bf16 %v2870_v36, %v2858_v28  ;;  %v989_v1 = vpack.c.bf16 %v2876_v40, %v2864_v32  ;;  %v2026_v22 = vld [vmem:[%s2903_s17] sm:$0xf]  ;;  %v2219_v25 = vld [vmem:[%s2903_s17 + $0x4] sm:$0xf0]  ;;  %v2218_v33 = vld [vmem:[%s2903_s17 + $0x4] sm:$0xf] }
 0x14f   : > { %v980_v2 = vpack.c.bf16 %v2846_v20, %v2834_v12  ;;  %v988_v5 = vpack.c.bf16 %v2852_v24, %v2840_v16  ;;  %v979_v6 = vpack.c.bf16 %v2822_v4, %v2810_v60  ;;  %v987_v9 = vpack.c.bf16 %v2828_v8, %v2816_v0  ;;  %v2058_v29 = vld [vmem:[%s2903_s17 + $0x40] sm:$0xf]  ;;  %v2227_v30 = vld [vmem:[%s2903_s17 + $0x44] sm:$0xf0]  ;;  %v2028_v37 = vld [vmem:[%s2903_s17 + $0x8] sm:$0xf0] }
 0x150   : > { %1071 = vmatpush.bf16.msra.mxu0 %v982_v56  ;;  %2330 = vmatpush.bf16.msra.mxu2 %v982_v56  ;;  %v978_v10 = vpack.c.bf16 %v2891_v51, %v2879_v43  ;;  %v986_v13 = vpack.c.bf16 %v2897_v55, %v2885_v47  ;;  %v977_v14 = vpack.c.bf16 %v2867_v35, %v2855_v27  ;;  %v2226_v38 = vld [vmem:[%s2903_s17 + $0x44] sm:$0xf]  ;;  %v2060_v41 = vld [vmem:[%s2903_s17 + $0x48] sm:$0xf0]  ;;  %v2034_v50 = vld [vmem:[%s2903_s17 + $0x10] sm:$0xf] }
 0x151   : > { %1120 = vmatpush.bf16.msra.mxu1 %v990_v61  ;;  %2338 = vmatpush.bf16.msra.mxu3 %v990_v61  ;;  %v985_v17 = vpack.c.bf16 %v2873_v39, %v2861_v31  ;;  %v976_v18 = vpack.c.bf16 %v2843_v19, %v2831_v11  ;;  %v984_v21 = vpack.c.bf16 %v2849_v23, %v2837_v15  ;;  %v2221_v53 = vld [vmem:[%s2903_s17 + $0x14] sm:$0xf0]  ;;  %v2066_v54 = vld [vmem:[%s2903_s17 + $0x50] sm:$0xf]  ;;  %v2220_v56 = vld [vmem:[%s2903_s17 + $0x14] sm:$0xf] }
 0x152   : > { %v975_v26 = vpack.c.bf16 %v2819_v3, %v2807_v59  ;;  %v983_v34 = vpack.c.bf16 %v2825_v7, %v2813_v63  ;;  %v2027_v42 = vor.u32 %v2219_v25, %v2026_v22  ;;  %v2059_v45 = vor.u32 %v2227_v30, %v2058_v29  ;;  %v2229_v58 = vld [vmem:[%s2903_s17 + $0x54] sm:$0xf0]  ;;  %v2036_v61 = vld [vmem:[%s2903_s17 + $0x18] sm:$0xf0]  ;;  %v2230_v22 = vld [vmem:[%s2903_s17 + $0x64] sm:$0xf] }
 0x153   : > { %v2031_v46 = vor.u32 %v2218_v33, %v2028_v37  ;;  %v2063_v49 = vor.u32 %v2226_v38, %v2060_v41  ;;  %v2076_v25 = vld [vmem:[%s2903_s17 + $0x68] sm:$0xf0]  ;;  %v2225_v37 = vld [vmem:[%s2903_s17 + $0x34] sm:$0xf0]  ;;  %v2082_v38 = vld [vmem:[%s2903_s17 + $0x70] sm:$0xf] }
 0x154   : > { %1072 = vmatpush.bf16.msra.mxu0 %v981_v62  ;;  %2331 = vmatpush.bf16.msra.mxu2 %v981_v62  ;;  %v2228_v62 = vld [vmem:[%s2903_s17 + $0x54] sm:$0xf]  ;;  %v2079_v33 = vor.u32 %v2230_v22, %v2076_v25  ;;  %v2233_v41 = vld [vmem:[%s2903_s17 + $0x74] sm:$0xf0] }
 0x155   : > { %1121 = vmatpush.bf16.msra.mxu1 %v989_v1  ;;  %2339 = vmatpush.bf16.msra.mxu3 %v989_v1  ;;  %v2068_v1 = vld [vmem:[%s2903_s17 + $0x58] sm:$0xf0] }
 0x158   : > { %1073 = vmatpush.bf16.msra.mxu0 %v980_v2  ;;  %2332 = vmatpush.bf16.msra.mxu2 %v980_v2  ;;  %v2035_v2 = vor.u32 %v2221_v53, %v2034_v50  ;;  %v2083_v53 = vor.u32 %v2233_v41, %v2082_v38 }
 0x159   : > { %1122 = vmatpush.bf16.msra.mxu1 %v988_v5  ;;  %2340 = vmatpush.bf16.msra.mxu3 %v988_v5  ;;  %v2067_v5 = vor.u32 %v2229_v58, %v2066_v54 }
 0x15c   : > { %1074 = vmatpush.bf16.msra.mxu0 %v979_v6  ;;  %2333 = vmatpush.bf16.msra.mxu2 %v979_v6  ;;  %v2039_v6 = vor.u32 %v2220_v56, %v2036_v61  ;;  %v943_v61 = vld [vmem:[#allocation2 + $0x30] sm:$0xff] }
 0x15d   : > { %1123 = vmatpush.bf16.msra.mxu1 %v987_v9  ;;  %2341 = vmatpush.bf16.msra.mxu3 %v987_v9  ;;  %v2071_v9 = vor.u32 %v2228_v62, %v2068_v1 }
 0x160   : > { %1075 = vmatpush.bf16.msra.mxu0 %v978_v10  ;;  %2334 = vmatpush.bf16.msra.mxu2 %v978_v10  ;;  %v2042_v10 = vld [vmem:[%s2903_s17 + $0x20] sm:$0xf] }
 0x161   : > { %1124 = vmatpush.bf16.msra.mxu1 %v986_v13  ;;  %2342 = vmatpush.bf16.msra.mxu3 %v986_v13  ;;  %v2223_v13 = vld [vmem:[%s2903_s17 + $0x24] sm:$0xf0] }
 0x164   : > { %1076 = vmatpush.bf16.msra.mxu0 %v977_v14  ;;  %2335 = vmatpush.bf16.msra.mxu2 %v977_v14  ;;  %v2074_v14 = vld [vmem:[%s2903_s17 + $0x60] sm:$0xf] }
 0x165   : > { %1125 = vmatpush.bf16.msra.mxu1 %v985_v17  ;;  %2343 = vmatpush.bf16.msra.mxu3 %v985_v17  ;;  %v2231_v17 = vld [vmem:[%s2903_s17 + $0x64] sm:$0xf0] }
 0x166   : > { %v2075_v29 = vor.u32 %v2231_v17, %v2074_v14  ;;  %v944_v14 = vld [vmem:[#allocation2] sm:$0xff] }
 0x168   : > { %1077 = vmatpush.bf16.msra.mxu0 %v976_v18  ;;  %2336 = vmatpush.bf16.msra.mxu2 %v976_v18  ;;  %v2222_v18 = vld [vmem:[%s2903_s17 + $0x24] sm:$0xf] }
 0x169   : > { %1126 = vmatpush.bf16.msra.mxu1 %v984_v21  ;;  %2344 = vmatpush.bf16.msra.mxu3 %v984_v21  ;;  %v2044_v21 = vld [vmem:[%s2903_s17 + $0x28] sm:$0xf0] }
 0x16a   : > { %v2047_v30 = vor.u32 %v2222_v18, %v2044_v21 }
 0x16c   : > { %1078 = vmatpush.bf16.msra.mxu0 %v975_v26  ;;  %2337 = vmatpush.bf16.msra.mxu2 %v975_v26  ;;  %v2043_v26 = vor.u32 %v2223_v13, %v2042_v10 }
 0x16d   : > { %1127 = vmatpush.bf16.msra.mxu1 %v983_v34  ;;  %2345 = vmatpush.bf16.msra.mxu3 %v983_v34  ;;  %v2050_v34 = vld [vmem:[%s2903_s17 + $0x30] sm:$0xf] }
 0x16e   : > { %v2051_v50 = vor.u32 %v2225_v37, %v2050_v34  ;;  %v945_v34 = vld [vmem:[#allocation2 + $0x58] sm:$0xff] }
 0x16f   : > { %1079 = vmatmul.bf16.vlgmr.msra.gmra.mxu0 %v2027_v42  ;;  %1099 = vmatmul.bf16.vlgmr.msra.gmra.mxu2 %v2059_v45  ;;  %v2224_v42 = vld [vmem:[%s2903_s17 + $0x34] sm:$0xf]  ;;  %v2052_v45 = vld [vmem:[%s2903_s17 + $0x38] sm:$0xf0] }
 0x170   : > { %1128 = vmatmul.bf16.vlgmr.msra.gmra.mxu1 %v2031_v46  ;;  %1148 = vmatmul.bf16.vlgmr.msra.gmra.mxu3 %v2063_v49  ;;  %v2232_v46 = vld [vmem:[%s2903_s17 + $0x74] sm:$0xf]  ;;  %v2084_v49 = vld [vmem:[%s2903_s17 + $0x78] sm:$0xf0]  ;;  %v2055_v54 = vor.u32 %v2224_v42, %v2052_v45 }
 0x171   : > { %v2087_v58 = vor.u32 %v2232_v46, %v2084_v49  ;;  %v953_v46 = vld [vmem:[#allocation2 + $0x10] sm:$0xff] }
 0x17f   : > { %1084 = vmatmul.bf16.gmra.mxu0 %v2035_v2  ;;  %1104 = vmatmul.bf16.gmra.mxu2 %v2067_v5 }
 0x180   : > { %1133 = vmatmul.bf16.gmra.mxu1 %v2039_v6  ;;  %1153 = vmatmul.bf16.gmra.mxu3 %v2071_v9  ;;  %v951_v6 = vld [vmem:[#allocation2 + $0x40] sm:$0xff] }
 0x18f   : > { %1089 = vmatmul.bf16.gmra.mxu0 %v2043_v26  ;;  %1109 = vmatmul.bf16.gmra.mxu2 %v2075_v29  ;;  %v952_v26 = vld [vmem:[#allocation2 + $0x20] sm:$0xff] }
 0x190   : > { %1138 = vmatmul.bf16.gmra.mxu1 %v2047_v30  ;;  %1158 = vmatmul.bf16.gmra.mxu3 %v2079_v33 }
 0x19f   : > { %1094 = vmatmul.bf16.gmra.mxu0 %v2051_v50  ;;  %1114 = vmatmul.bf16.gmra.mxu2 %v2083_v53 }
 0x1a0   : > { %1143 = vmatmul.bf16.gmra.mxu1 %v2055_v54  ;;  %1163 = vmatmul.bf16.gmra.mxu3 %v2087_v58  ;;  %v946_v54 = vld [vmem:[#allocation2 + $0x18] sm:$0xff] }
 0x1ec   : > { %v1080_v56 = vpop.f32.mrf.mxu0 }
 0x1ed   : > { %v1129_v62 = vpop.f32.mrf.mxu1 }
 0x1ee   : > { %v1130_v1 = vadd.f32 %v1129_v62, %v1080_v56 }
 0x1f0   : > { %v1169_v2 = vadd.f32 %v1130_v1, %v943_v61 }
 0x1f2   : > { %1185 = vst [vmem:[#allocation2 + $0x30] sm:$0xff] %v1169_v2  ;;  %v1100_v5 = vpop.f32.mrf.mxu2  ;;  %v954_v2 = vld [vmem:[#allocation2 + $0x38] sm:$0xff] }
 0x1f3   : > { %v1149_v9 = vpop.f32.mrf.mxu3 }
 0x1f4   : > { %v1150_v10 = vadd.f32 %v1149_v9, %v1100_v5  ;;  %v1082_v13 = vpop.f32.mrf.mxu0 }
 0x1f5   : > { %v1131_v17 = vpop.f32.mrf.mxu1 }
 0x1f6   : > { %v1177_v18 = vadd.f32 %v1150_v10, %v951_v6  ;;  %v1132_v21 = vadd.f32 %v1131_v17, %v1082_v13  ;;  %v947_v10 = vld [vmem:[#allocation2 + $0x50] sm:$0xff] }
 0x1f8   : > { %1193 = vst [vmem:[#allocation2 + $0x40] sm:$0xff] %v1177_v18  ;;  %v1170_v22 = vadd.f32 %v1132_v21, %v944_v14 }
 0x1fa   : > { %1186 = vst [vmem:[#allocation2] sm:$0xff] %v1170_v22  ;;  %v1102_v25 = vpop.f32.mrf.mxu2  ;;  %v955_v22 = vld [vmem:[#allocation2 + $0x60] sm:$0xff] }
 0x1fb   : > { %v1151_v29 = vpop.f32.mrf.mxu3 }
 0x1fc   : > { %v1152_v30 = vadd.f32 %v1151_v29, %v1102_v25  ;;  %v1085_v33 = vpop.f32.mrf.mxu0 }
 0x1fd   : > { %v1134_v37 = vpop.f32.mrf.mxu1 }
 0x1fe   : > { %v1178_v38 = vadd.f32 %v1152_v30, %v952_v26  ;;  %v1135_v41 = vadd.f32 %v1134_v37, %v1085_v33  ;;  %v948_v30 = vld [vmem:[#allocation2 + $0x68] sm:$0xff] }
 0x200   : > { %1194 = vst [vmem:[#allocation2 + $0x20] sm:$0xff] %v1178_v38  ;;  %v1171_v42 = vadd.f32 %v1135_v41, %v945_v34 }
 0x202   : > { %1187 = vst [vmem:[#allocation2 + $0x58] sm:$0xff] %v1171_v42  ;;  %v1105_v45 = vpop.f32.mrf.mxu2  ;;  %v956_v42 = vld [vmem:[#allocation2 + $0x70] sm:$0xff] }
 0x203   : > { %v1154_v49 = vpop.f32.mrf.mxu3 }
 0x204   : > { %v1155_v50 = vadd.f32 %v1154_v49, %v1105_v45  ;;  %v1087_v53 = vpop.f32.mrf.mxu0 }
 0x205   : > { %v1136_v58 = vpop.f32.mrf.mxu1 }
 0x206   : > { %v1179_v56 = vadd.f32 %v1155_v50, %v953_v46  ;;  %v1137_v61 = vadd.f32 %v1136_v58, %v1087_v53  ;;  %v949_v50 = vld [vmem:[#allocation2 + $0x8] sm:$0xff] }
 0x208   : > { %1195 = vst [vmem:[#allocation2 + $0x10] sm:$0xff] %v1179_v56  ;;  %v1172_v62 = vadd.f32 %v1137_v61, %v946_v54 }
 0x20a   : > { %1188 = vst [vmem:[#allocation2 + $0x18] sm:$0xff] %v1172_v62  ;;  %v1107_v1 = vpop.f32.mrf.mxu2  ;;  %v957_v62 = vld [vmem:[#allocation2 + $0x78] sm:$0xff] }
 0x20b   : > { %v1156_v5 = vpop.f32.mrf.mxu3 }
 0x20c   : > { %v1157_v6 = vadd.f32 %v1156_v5, %v1107_v1  ;;  %v1090_v9 = vpop.f32.mrf.mxu0 }
 0x20d   : > { %v1139_v13 = vpop.f32.mrf.mxu1 }
 0x20e   : > { %v1180_v14 = vadd.f32 %v1157_v6, %v954_v2  ;;  %v1140_v17 = vadd.f32 %v1139_v13, %v1090_v9  ;;  %v950_v6 = vld [vmem:[#allocation2 + $0x48] sm:$0xff] }
 0x210   : > { %1196 = vst [vmem:[#allocation2 + $0x38] sm:$0xff] %v1180_v14  ;;  %v1173_v18 = vadd.f32 %v1140_v17, %v947_v10 }
 0x212   : > { %1189 = vst [vmem:[#allocation2 + $0x50] sm:$0xff] %v1173_v18  ;;  %v1110_v21 = vpop.f32.mrf.mxu2  ;;  %v958_v18 = vld [vmem:[#allocation2 + $0x28] sm:$0xff] }
 0x213   : > { %v1159_v25 = vpop.f32.mrf.mxu3 }
 0x214   : > { %v1160_v26 = vadd.f32 %v1159_v25, %v1110_v21  ;;  %v1092_v29 = vpop.f32.mrf.mxu0 }
 0x215   : > { %v1141_v33 = vpop.f32.mrf.mxu1 }
 0x216   : > { %v1181_v34 = vadd.f32 %v1160_v26, %v955_v22  ;;  %v1142_v37 = vadd.f32 %v1141_v33, %v1092_v29 }
 0x218   : > { %1197 = vst [vmem:[#allocation2 + $0x60] sm:$0xff] %v1181_v34  ;;  %v1174_v38 = vadd.f32 %v1142_v37, %v948_v30 }
 0x21a   : > { %1190 = vst [vmem:[#allocation2 + $0x68] sm:$0xff] %v1174_v38  ;;  %v1112_v41 = vpop.f32.mrf.mxu2 }
 0x21b   : > { %v1161_v45 = vpop.f32.mrf.mxu3 }
 0x21c   : > { %v1162_v46 = vadd.f32 %v1161_v45, %v1112_v41  ;;  %v1095_v49 = vpop.f32.mrf.mxu0 }
 0x21d   : > { %v1144_v53 = vpop.f32.mrf.mxu1 }
 0x21e   : > { %v1182_v54 = vadd.f32 %v1162_v46, %v956_v42  ;;  %v1145_v58 = vadd.f32 %v1144_v53, %v1095_v49 }
 0x220   : > { %1198 = vst [vmem:[#allocation2 + $0x70] sm:$0xff] %v1182_v54  ;;  %v1175_v56 = vadd.f32 %v1145_v58, %v949_v50 }
 0x222   : > { %1191 = vst [vmem:[#allocation2 + $0x8] sm:$0xff] %v1175_v56  ;;  %v1115_v61 = vpop.f32.mrf.mxu2 }
 0x223   : > { %v1164_v1 = vpop.f32.mrf.mxu3 }
 0x224   : > { %v1165_v2 = vadd.f32 %v1164_v1, %v1115_v61  ;;  %v1097_v5 = vpop.f32.mrf.mxu0 }
 0x225   : > { %v1146_v9 = vpop.f32.mrf.mxu1 }
 0x226   : > { %v1183_v10 = vadd.f32 %v1165_v2, %v957_v62  ;;  %v1147_v13 = vadd.f32 %v1146_v9, %v1097_v5 }
 0x228   : > { %1199 = vst [vmem:[#allocation2 + $0x78] sm:$0xff] %v1183_v10  ;;  %v1176_v14 = vadd.f32 %v1147_v13, %v950_v6 }
 0x22a   : > { %1192 = vst [vmem:[#allocation2 + $0x48] sm:$0xff] %v1176_v14  ;;  %v1117_v17 = vpop.f32.mrf.mxu2 }
 0x22b   : > { %v1166_v21 = vpop.f32.mrf.mxu3 }
 0x22c   : > { %v1167_v22 = vadd.f32 %v1166_v21, %v1117_v17 }
 0x22e   : > { %v1184_v25 = vadd.f32 %v1167_v22, %v958_v18 }
 0x230   : > { %1200 = vst [vmem:[#allocation2 + $0x28] sm:$0xff] %v1184_v25 }
 0x231 PF: > { %p2088_p2 = scmp.ne.s32.totalorder %s2530_s24, 2 }
 0x233   : > { %1204 = sbr.rel (%p2088_p2) target bundleno = 579 (0x243), region = 131 }
 0x238   : > { %v1205_v26 = vld [vmem:[#allocation2 + $0x30] sm:$0xff]  ;;  %v1206_v29 = vld [vmem:[#allocation2] sm:$0xff]  ;;  %v1207_v30 = vld [vmem:[#allocation2 + $0x58] sm:$0xff] }
 0x239   : > { %v2262_v33 = vpack.c.bf16 %v1206_v29, %v1205_v26  ;;  %v1208_v34 = vld [vmem:[#allocation2 + $0x18] sm:$0xff]  ;;  %v1209_v37 = vld [vmem:[#allocation2 + $0x50] sm:$0xff]  ;;  %v1210_v38 = vld [vmem:[#allocation2 + $0x68] sm:$0xff] }
 0x23a   : > { %v2267_v41 = vpack.c.bf16 %v1208_v34, %v1207_v30  ;;  %v2272_v42 = vpack.c.bf16 %v1210_v38, %v1209_v37  ;;  %v1211_v45 = vld [vmem:[#allocation2 + $0x8] sm:$0xff]  ;;  %v1213_v49 = vld [vmem:[#allocation2 + $0x40] sm:$0xff]  ;;  %v1215_v54 = vld [vmem:[#allocation2 + $0x10] sm:$0xff] }
 0x23b   : > { %v1212_v46 = vld [vmem:[#allocation2 + $0x48] sm:$0xff]  ;;  %2263 = vst [vmem:[#allocation3 + $0x28] sm:$0xff] %v2262_v33   ;;  %v1214_v53 = vld [vmem:[#allocation2 + $0x20] sm:$0xff]  ;;  %v1216_v58 = vld [vmem:[#allocation2 + $0x38] sm:$0xff] }
 0x23c   : > { %v2277_v50 = vpack.c.bf16 %v1212_v46, %v1211_v45  ;;  %2299 = vst [vmem:[#allocation3] sm:$0xff] %v2267_v41   ;;  %v2282_v56 = vpack.c.bf16 %v1214_v53, %v1213_v49  ;;  %v2287_v61 = vpack.c.bf16 %v1216_v58, %v1215_v54  ;;  %v1217_v62 = vld [vmem:[#allocation2 + $0x60] sm:$0xff]  ;;  %v1218_v1 = vld [vmem:[#allocation2 + $0x70] sm:$0xff]  ;;  %v1219_v2 = vld [vmem:[#allocation2 + $0x78] sm:$0xff] }
 0x23d   : > { %2300 = vst [vmem:[#allocation3 + $0x10] sm:$0xff] %v2272_v42   ;;  %v2292_v5 = vpack.c.bf16 %v1218_v1, %v1217_v62  ;;  %v1220_v6 = vld [vmem:[#allocation2 + $0x28] sm:$0xff] }
 0x23e   : > { %2301 = vst [vmem:[#allocation3 + $0x20] sm:$0xff] %v2277_v50   ;;  %v2297_v9 = vpack.c.bf16 %v1220_v6, %v1219_v2 }
 0x23f   : > { %2302 = vst [vmem:[#allocation3 + $0x18] sm:$0xff] %v2282_v56  }
 0x240   : > { %2303 = vst [vmem:[#allocation3 + $0x8] sm:$0xff] %v2287_v61  }
 0x241   : > { %2304 = vst [vmem:[#allocation3 + $0x38] sm:$0xff] %v2292_v5  }
 0x242   : > { %2305 = vst [vmem:[#allocation3 + $0x30] sm:$0xff] %v2297_v9  }
 0x243 PF: > { %p2089_p3 = scmp.lt.s32.totalorder %s2530_s24, 2 }
 0x245   : > { %1256 = sbr.rel (%p2089_p3) target bundleno = 811 (0x32b), region = 135 }
 0x24a   : > { %v2257_v10 = vld [vmem:[#allocation3 + $0x30] sm:$0xff]  ;;  %v2256_v13 = vld [vmem:[#allocation3 + $0x38] sm:$0xff]  ;;  %v2255_v14 = vld [vmem:[#allocation3 + $0x8] sm:$0xff] }
 0x24b   : > { %1449 = vmatpush.bf16.msra.mxu0 %v2257_v10  ;;  %2346 = vmatpush.bf16.msra.mxu1 %v2257_v10  ;;  %v2254_v17 = vld [vmem:[#allocation3 + $0x18] sm:$0xff]  ;;  %v2253_v18 = vld [vmem:[#allocation3 + $0x20] sm:$0xff]  ;;  %v2252_v21 = vld [vmem:[#allocation3 + $0x10] sm:$0xff] }
 0x24c   : > { %2347 = vmatpush.bf16.msra.mxu2 %v2257_v10  ;;  %2348 = vmatpush.bf16.msra.mxu3 %v2257_v10  ;;  %v2251_v22 = vld [vmem:[#allocation3] sm:$0xff]  ;;  %v2250_v25 = vld [vmem:[#allocation3 + $0x28] sm:$0xff]  ;;  %v2236_v42 = vld [vmem:[%s2765_s9 + $0x10] sm:$0xff] }
 0x24d   : > { %v2234_v26 = vld [vmem:[%s2765_s9] sm:$0xff]  ;;  %v2235_v34 = vld [vmem:[%s2765_s9 + $0x8] sm:$0xff]  ;;  %v2240_v45 = vld [vmem:[%s2765_s9 + $0x30] sm:$0xff] }
 0x24e   : > { %v2238_v29 = vld [vmem:[%s2765_s9 + $0x20] sm:$0xff]  ;;  %v2239_v37 = vld [vmem:[%s2765_s9 + $0x28] sm:$0xff]  ;;  %v2244_v46 = vld [vmem:[%s2765_s9 + $0x50] sm:$0xff] }
 0x24f   : > { %1450 = vmatpush.bf16.msra.mxu0 %v2256_v13  ;;  %2349 = vmatpush.bf16.msra.mxu1 %v2256_v13  ;;  %v2242_v30 = vld [vmem:[%s2765_s9 + $0x40] sm:$0xff]  ;;  %v2243_v38 = vld [vmem:[%s2765_s9 + $0x48] sm:$0xff]  ;;  %v2248_v49 = vld [vmem:[%s2765_s9 + $0x70] sm:$0xff] }
 0x250   : > { %2350 = vmatpush.bf16.msra.mxu2 %v2256_v13  ;;  %2351 = vmatpush.bf16.msra.mxu3 %v2256_v13  ;;  %v2246_v33 = vld [vmem:[%s2765_s9 + $0x60] sm:$0xff]  ;;  %v2247_v41 = vld [vmem:[%s2765_s9 + $0x68] sm:$0xff]  ;;  %v2237_v50 = vld [vmem:[%s2765_s9 + $0x18] sm:$0xff] }
 0x251   : > { %v2241_v53 = vld [vmem:[%s2765_s9 + $0x38] sm:$0xff] }
 0x252   : > { %v2245_v54 = vld [vmem:[%s2765_s9 + $0x58] sm:$0xff] }
 0x253   : > { %1451 = vmatpush.bf16.msra.mxu0 %v2255_v14  ;;  %2352 = vmatpush.bf16.msra.mxu1 %v2255_v14  ;;  %v2249_v58 = vld [vmem:[%s2765_s9 + $0x78] sm:$0xff] }
 0x254   : > { %2353 = vmatpush.bf16.msra.mxu2 %v2255_v14  ;;  %2354 = vmatpush.bf16.msra.mxu3 %v2255_v14 }
 0x257   : > { %1452 = vmatpush.bf16.msra.mxu0 %v2254_v17  ;;  %2355 = vmatpush.bf16.msra.mxu1 %v2254_v17 }
 0x258   : > { %2356 = vmatpush.bf16.msra.mxu2 %v2254_v17  ;;  %2357 = vmatpush.bf16.msra.mxu3 %v2254_v17 }
 0x25b   : > { %1453 = vmatpush.bf16.msra.mxu0 %v2253_v18  ;;  %2358 = vmatpush.bf16.msra.mxu1 %v2253_v18 }
 0x25c   : > { %2359 = vmatpush.bf16.msra.mxu2 %v2253_v18  ;;  %2360 = vmatpush.bf16.msra.mxu3 %v2253_v18 }
 0x25f   : > { %1454 = vmatpush.bf16.msra.mxu0 %v2252_v21  ;;  %2361 = vmatpush.bf16.msra.mxu1 %v2252_v21 }
 0x260   : > { %2362 = vmatpush.bf16.msra.mxu2 %v2252_v21  ;;  %2363 = vmatpush.bf16.msra.mxu3 %v2252_v21 }
 0x263   : > { %1455 = vmatpush.bf16.msra.mxu0 %v2251_v22  ;;  %2364 = vmatpush.bf16.msra.mxu1 %v2251_v22 }
 0x264   : > { %2365 = vmatpush.bf16.msra.mxu2 %v2251_v22  ;;  %2366 = vmatpush.bf16.msra.mxu3 %v2251_v22 }
 0x267   : > { %1456 = vmatpush.bf16.msra.mxu0 %v2250_v25  ;;  %2367 = vmatpush.bf16.msra.mxu1 %v2250_v25 }
 0x268   : > { %2368 = vmatpush.bf16.msra.mxu2 %v2250_v25  ;;  %2369 = vmatpush.bf16.msra.mxu3 %v2250_v25 }
 0x26a   : > { %1457 = vmatmul.bf16.vlgmr.msra.gmra.mxu0 %v2234_v26  ;;  %1477 = vmatmul.bf16.vlgmr.msra.gmra.mxu1 %v2238_v29 }
 0x26b   : > { %1497 = vmatmul.bf16.vlgmr.msra.gmra.mxu2 %v2242_v30  ;;  %1517 = vmatmul.bf16.vlgmr.msra.gmra.mxu3 %v2246_v33 }
 0x27a   : > { %1462 = vmatmul.bf16.gmra.mxu0 %v2235_v34  ;;  %1482 = vmatmul.bf16.gmra.mxu1 %v2239_v37 }
 0x27b   : > { %1502 = vmatmul.bf16.gmra.mxu2 %v2243_v38  ;;  %1522 = vmatmul.bf16.gmra.mxu3 %v2247_v41 }
 0x28a   : > { %1467 = vmatmul.bf16.gmra.mxu0 %v2236_v42  ;;  %1487 = vmatmul.bf16.gmra.mxu1 %v2240_v45 }
 0x28b   : > { %1507 = vmatmul.bf16.gmra.mxu2 %v2244_v46  ;;  %1527 = vmatmul.bf16.gmra.mxu3 %v2248_v49 }
 0x29a   : > { %1472 = vmatmul.bf16.gmra.mxu0 %v2237_v50  ;;  %1492 = vmatmul.bf16.gmra.mxu1 %v2241_v53 }
 0x29b   : > { %1512 = vmatmul.bf16.gmra.mxu2 %v2245_v54  ;;  %1532 = vmatmul.bf16.gmra.mxu3 %v2249_v58 }
 0x2e7   : > { %v1458_v56 = vpop.f32.mrf.mxu0  ;;  %v1478_v61 = vpop.f32.mrf.mxu1 }
 0x2e8   : > { %v1538_v62 = vadd.f32 %v1458_v56, %v2807_v59  ;;  %v1546_v1 = vadd.f32 %v1478_v61, %v2810_v60 }
 0x2ea   : > { %1570 = vst [vmem:[%s2906_s15] sm:$0xff] %v1538_v62 }
 0x2eb   : > { %1578 = vst [vmem:[%s2906_s15 + $0x40] sm:$0xff] %v1546_v1 }
 0x2ee   : > { %v1498_v2 = vpop.f32.mrf.mxu2  ;;  %v1518_v5 = vpop.f32.mrf.mxu3 }
 0x2ef   : > { %v1554_v6 = vadd.f32 %v1498_v2, %v2813_v63  ;;  %v1562_v9 = vadd.f32 %v1518_v5, %v2816_v0  ;;  %v1460_v10 = vpop.f32.mrf.mxu0  ;;  %v1480_v13 = vpop.f32.mrf.mxu1 }
 0x2f0   : > { %v1539_v14 = vadd.f32 %v1460_v10, %v2819_v3  ;;  %v1547_v17 = vadd.f32 %v1480_v13, %v2822_v4 }
 0x2f1   : > { %1586 = vst [vmem:[%s2906_s15 + $0x80] sm:$0xff] %v1554_v6 }
 0x2f2   : > { %1594 = vst [vmem:[%s2906_s15 + $0xc0] sm:$0xff] %v1562_v9 }
 0x2f3   : > { %1571 = vst [vmem:[%s2906_s15 + $0x8] sm:$0xff] %v1539_v14 }
 0x2f4   : > { %1579 = vst [vmem:[%s2906_s15 + $0x48] sm:$0xff] %v1547_v17 }
 0x2f6   : > { %v1500_v59 = vpop.f32.mrf.mxu2  ;;  %v1520_v60 = vpop.f32.mrf.mxu3 }
 0x2f7   : > { %v1555_v63 = vadd.f32 %v1500_v59, %v2825_v7  ;;  %v1563_v0 = vadd.f32 %v1520_v60, %v2828_v8  ;;  %v1463_v18 = vpop.f32.mrf.mxu0  ;;  %v1483_v21 = vpop.f32.mrf.mxu1 }
 0x2f8   : > { %v1540_v3 = vadd.f32 %v1463_v18, %v2831_v11  ;;  %v1548_v4 = vadd.f32 %v1483_v21, %v2834_v12 }
 0x2f9   : > { %1587 = vst [vmem:[%s2906_s15 + $0x88] sm:$0xff] %v1555_v63 }
 0x2fa   : > { %1595 = vst [vmem:[%s2906_s15 + $0xc8] sm:$0xff] %v1563_v0 }
 0x2fb   : > { %1572 = vst [vmem:[%s2906_s15 + $0x10] sm:$0xff] %v1540_v3 }
 0x2fc   : > { %1580 = vst [vmem:[%s2906_s15 + $0x50] sm:$0xff] %v1548_v4 }
 0x2fe   : > { %v1503_v22 = vpop.f32.mrf.mxu2  ;;  %v1523_v25 = vpop.f32.mrf.mxu3 }
 0x2ff   : > { %v1556_v7 = vadd.f32 %v1503_v22, %v2837_v15  ;;  %v1564_v8 = vadd.f32 %v1523_v25, %v2840_v16  ;;  %v1465_v26 = vpop.f32.mrf.mxu0  ;;  %v1485_v29 = vpop.f32.mrf.mxu1 }
 0x300   : > { %v1541_v11 = vadd.f32 %v1465_v26, %v2843_v19  ;;  %v1549_v12 = vadd.f32 %v1485_v29, %v2846_v20 }
 0x301   : > { %1588 = vst [vmem:[%s2906_s15 + $0x90] sm:$0xff] %v1556_v7 }
 0x302   : > { %1596 = vst [vmem:[%s2906_s15 + $0xd0] sm:$0xff] %v1564_v8 }
 0x303   : > { %1573 = vst [vmem:[%s2906_s15 + $0x18] sm:$0xff] %v1541_v11 }
 0x304   : > { %1581 = vst [vmem:[%s2906_s15 + $0x58] sm:$0xff] %v1549_v12 }
 0x306   : > { %v1505_v30 = vpop.f32.mrf.mxu2  ;;  %v1525_v33 = vpop.f32.mrf.mxu3 }
 0x307   : > { %v1557_v15 = vadd.f32 %v1505_v30, %v2849_v23  ;;  %v1565_v16 = vadd.f32 %v1525_v33, %v2852_v24  ;;  %v1468_v34 = vpop.f32.mrf.mxu0  ;;  %v1488_v37 = vpop.f32.mrf.mxu1 }
 0x308   : > { %v1542_v19 = vadd.f32 %v1468_v34, %v2855_v27  ;;  %v1550_v20 = vadd.f32 %v1488_v37, %v2858_v28 }
 0x309   : > { %1589 = vst [vmem:[%s2906_s15 + $0x98] sm:$0xff] %v1557_v15 }
 0x30a   : > { %1597 = vst [vmem:[%s2906_s15 + $0xd8] sm:$0xff] %v1565_v16 }
 0x30b   : > { %1574 = vst [vmem:[%s2906_s15 + $0x20] sm:$0xff] %v1542_v19 }
 0x30c   : > { %1582 = vst [vmem:[%s2906_s15 + $0x60] sm:$0xff] %v1550_v20 }
 0x30e   : > { %v1508_v38 = vpop.f32.mrf.mxu2  ;;  %v1528_v41 = vpop.f32.mrf.mxu3 }
 0x30f   : > { %v1558_v23 = vadd.f32 %v1508_v38, %v2861_v31  ;;  %v1566_v24 = vadd.f32 %v1528_v41, %v2864_v32  ;;  %v1470_v42 = vpop.f32.mrf.mxu0  ;;  %v1490_v45 = vpop.f32.mrf.mxu1 }
 0x310   : > { %v1543_v27 = vadd.f32 %v1470_v42, %v2867_v35  ;;  %v1551_v28 = vadd.f32 %v1490_v45, %v2870_v36 }
 0x311   : > { %1590 = vst [vmem:[%s2906_s15 + $0xa0] sm:$0xff] %v1558_v23 }
 0x312   : > { %1598 = vst [vmem:[%s2906_s15 + $0xe0] sm:$0xff] %v1566_v24 }
 0x313   : > { %1575 = vst [vmem:[%s2906_s15 + $0x28] sm:$0xff] %v1543_v27 }
 0x314   : > { %1583 = vst [vmem:[%s2906_s15 + $0x68] sm:$0xff] %v1551_v28 }
 0x316   : > { %v1510_v46 = vpop.f32.mrf.mxu2  ;;  %v1530_v49 = vpop.f32.mrf.mxu3 }
 0x317   : > { %v1559_v31 = vadd.f32 %v1510_v46, %v2873_v39  ;;  %v1567_v32 = vadd.f32 %v1530_v49, %v2876_v40  ;;  %v1473_v50 = vpop.f32.mrf.mxu0  ;;  %v1493_v53 = vpop.f32.mrf.mxu1 }
 0x318   : > { %v1544_v35 = vadd.f32 %v1473_v50, %v2879_v43  ;;  %v1552_v36 = vadd.f32 %v1493_v53, %v2882_v44 }
 0x319   : > { %1591 = vst [vmem:[%s2906_s15 + $0xa8] sm:$0xff] %v1559_v31 }
 0x31a   : > { %1599 = vst [vmem:[%s2906_s15 + $0xe8] sm:$0xff] %v1567_v32 }
 0x31b   : > { %1576 = vst [vmem:[%s2906_s15 + $0x30] sm:$0xff] %v1544_v35 }
 0x31c   : > { %1584 = vst [vmem:[%s2906_s15 + $0x70] sm:$0xff] %v1552_v36 }
 0x31e   : > { %v1513_v54 = vpop.f32.mrf.mxu2  ;;  %v1533_v58 = vpop.f32.mrf.mxu3 }
 0x31f   : > { %v1560_v39 = vadd.f32 %v1513_v54, %v2885_v47  ;;  %v1568_v40 = vadd.f32 %v1533_v58, %v2888_v48  ;;  %v1475_v56 = vpop.f32.mrf.mxu0  ;;  %v1495_v61 = vpop.f32.mrf.mxu1 }
 0x320   : > { %v1545_v43 = vadd.f32 %v1475_v56, %v2891_v51  ;;  %v1553_v62 = vadd.f32 %v1495_v61, %v2894_v52 }
 0x321   : > { %1592 = vst [vmem:[%s2906_s15 + $0xb0] sm:$0xff] %v1560_v39 }
 0x322   : > { %1600 = vst [vmem:[%s2906_s15 + $0xf0] sm:$0xff] %v1568_v40 }
 0x323   : > { %1577 = vst [vmem:[%s2906_s15 + $0x38] sm:$0xff] %v1545_v43 }
 0x324   : > { %1585 = vst [vmem:[%s2906_s15 + $0x78] sm:$0xff] %v1553_v62 }
 0x326   : > { %v1515_v44 = vpop.f32.mrf.mxu2  ;;  %v1535_v1 = vpop.f32.mrf.mxu3 }
 0x327   : > { %v1561_v2 = vadd.f32 %v1515_v44, %v2897_v55  ;;  %v1569_v5 = vadd.f32 %v1535_v1, %v2900_v57 }
 0x329   : > { %1593 = vst [vmem:[%s2906_s15 + $0xb8] sm:$0xff] %v1561_v2 }
 0x32a   : > { %1601 = vst [vmem:[%s2906_s15 + $0xf8] sm:$0xff] %v1569_v5 }
 0x32b PF: > { %1608 = sbr.rel (!%p2680_p1) target bundleno = 851 (0x353), region = 139  ;;  %s2258_s24 = sshll.u32 (%p2680_p1), %s3205_s11, 6  ;;  %v1707_v47 = vld [vmem:[%s2906_s15] sm:$0xff] (%p2680_p1)  ;;  %v1709_v48 = vld [vmem:[%s2906_s15 + $0x8] sm:$0xff] (%p2680_p1)  ;;  %v1711_v51 = vld [vmem:[%s2906_s15 + $0x10] sm:$0xff] (%p2680_p1) }
 0x32c   : > { %s1614_s14 = sadd.s32 (%p2680_p1), %s2534_s25, %s2258_s24  ;;  %s3180_s6 = sld [smem:[#allocation12_spill]] (%p2680_p1)  ;;  %v1713_v52 = vld [vmem:[%s2906_s15 + $0x18] sm:$0xff] (%p2680_p1)  ;;  %v1715_v55 = vld [vmem:[%s2906_s15 + $0x20] sm:$0xff] (%p2680_p1)  ;;  %v1717_v57 = vld [vmem:[%s2906_s15 + $0x28] sm:$0xff] (%p2680_p1) }
 0x32d   : > { %s2190_s5 = sshll.u32 (%p2680_p1), %s1614_s14, 3  ;;  %v1719_v6 = vld [vmem:[%s2906_s15 + $0x30] sm:$0xff] (%p2680_p1)  ;;  %v1721_v9 = vld [vmem:[%s2906_s15 + $0x38] sm:$0xff] (%p2680_p1)  ;;  %v1723_v10 = vld [vmem:[%s2906_s15 + $0x40] sm:$0xff] (%p2680_p1) }
 0x32e   : > { %v1725_v13 = vld [vmem:[%s2906_s15 + $0x48] sm:$0xff] (%p2680_p1)  ;;  %v1727_v14 = vld [vmem:[%s2906_s15 + $0x50] sm:$0xff] (%p2680_p1)  ;;  %v1729_v17 = vld [vmem:[%s2906_s15 + $0x58] sm:$0xff] (%p2680_p1) }
 0x32f   : > { %v1731_v59 = vld [vmem:[%s2906_s15 + $0x60] sm:$0xff] (%p2680_p1)  ;;  %v1733_v60 = vld [vmem:[%s2906_s15 + $0x68] sm:$0xff] (%p2680_p1)  ;;  %v1735_v63 = vld [vmem:[%s2906_s15 + $0x70] sm:$0xff] (%p2680_p1) }
 0x330   : > { %v1737_v0 = vld [vmem:[%s2906_s15 + $0x78] sm:$0xff]  ;;  %v1739_v18 = vld [vmem:[%s2906_s15 + $0x80] sm:$0xff]  ;;  %v1741_v21 = vld [vmem:[%s2906_s15 + $0x88] sm:$0xff] }
 0x331   : > { %v1743_v3 = vld [vmem:[%s2906_s15 + $0x90] sm:$0xff]  ;;  %v1745_v4 = vld [vmem:[%s2906_s15 + $0x98] sm:$0xff]  ;;  %v1747_v22 = vld [vmem:[%s2906_s15 + $0xa0] sm:$0xff] }
 0x332   : > { %s3065_s8 = scalar_lea.vmem %s3180_s6, %s2190_s5  ;;  %v1749_v25 = vld [vmem:[%s2906_s15 + $0xa8] sm:$0xff]  ;;  %v1751_v7 = vld [vmem:[%s2906_s15 + $0xb0] sm:$0xff]  ;;  %v1753_v8 = vld [vmem:[%s2906_s15 + $0xb8] sm:$0xff] }
 0x333   : > { %1708 = vst [vmem:[%s3065_s8] sm:$0xff] %v1707_v47  ;;  %v1755_v26 = vld [vmem:[%s2906_s15 + $0xc0] sm:$0xff]  ;;  %v1757_v29 = vld [vmem:[%s2906_s15 + $0xc8] sm:$0xff]  ;;  %v1759_v11 = vld [vmem:[%s2906_s15 + $0xd0] sm:$0xff] }
 0x334   : > { %1710 = vst [vmem:[%s3065_s8 + $0x10] sm:$0xff] %v1709_v48  ;;  %v1761_v12 = vld [vmem:[%s2906_s15 + $0xd8] sm:$0xff]  ;;  %v1763_v30 = vld [vmem:[%s2906_s15 + $0xe0] sm:$0xff]  ;;  %v1765_v33 = vld [vmem:[%s2906_s15 + $0xe8] sm:$0xff] }
 0x335   : > { %1712 = vst [vmem:[%s3065_s8 + $0x20] sm:$0xff] %v1711_v51  ;;  %v1767_v15 = vld [vmem:[%s2906_s15 + $0xf0] sm:$0xff]  ;;  %v1769_v16 = vld [vmem:[%s2906_s15 + $0xf8] sm:$0xff] }
 0x336   : > { %1714 = vst [vmem:[%s3065_s8 + $0x30] sm:$0xff] %v1713_v52 }
 0x337   : > { %1716 = vst [vmem:[%s3065_s8 + $0x40] sm:$0xff] %v1715_v55 }
 0x338   : > { %1718 = vst [vmem:[%s3065_s8 + $0x50] sm:$0xff] %v1717_v57 }
 0x339   : > { %1720 = vst [vmem:[%s3065_s8 + $0x60] sm:$0xff] %v1719_v6 }
 0x33a   : > { %1722 = vst [vmem:[%s3065_s8 + $0x70] sm:$0xff] %v1721_v9 }
 0x33b   : > { %1724 = vst [vmem:[%s3065_s8 + $0x80] sm:$0xff] %v1723_v10 }
 0x33c   : > { %1726 = vst [vmem:[%s3065_s8 + $0x90] sm:$0xff] %v1725_v13 }
 0x33d   : > { %1728 = vst [vmem:[%s3065_s8 + $0xa0] sm:$0xff] %v1727_v14 }
 0x33e   : > { %1730 = vst [vmem:[%s3065_s8 + $0xb0] sm:$0xff] %v1729_v17 }
 0x33f   : > { %1732 = vst [vmem:[%s3065_s8 + $0xc0] sm:$0xff] %v1731_v59 }
 0x340   : > { %1734 = vst [vmem:[%s3065_s8 + $0xd0] sm:$0xff] %v1733_v60 }
 0x341   : > { %1736 = vst [vmem:[%s3065_s8 + $0xe0] sm:$0xff] %v1735_v63 }
 0x342   : > { %1738 = vst [vmem:[%s3065_s8 + $0xf0] sm:$0xff] %v1737_v0 }
 0x343   : > { %1740 = vst [vmem:[%s3065_s8 + $0x100] sm:$0xff] %v1739_v18 }
 0x344   : > { %1742 = vst [vmem:[%s3065_s8 + $0x110] sm:$0xff] %v1741_v21 }
 0x345   : > { %1744 = vst [vmem:[%s3065_s8 + $0x120] sm:$0xff] %v1743_v3 }
 0x346   : > { %1746 = vst [vmem:[%s3065_s8 + $0x130] sm:$0xff] %v1745_v4 }
 0x347   : > { %1748 = vst [vmem:[%s3065_s8 + $0x140] sm:$0xff] %v1747_v22 }
 0x348   : > { %1750 = vst [vmem:[%s3065_s8 + $0x150] sm:$0xff] %v1749_v25 }
 0x349   : > { %1752 = vst [vmem:[%s3065_s8 + $0x160] sm:$0xff] %v1751_v7 }
 0x34a   : > { %1754 = vst [vmem:[%s3065_s8 + $0x170] sm:$0xff] %v1753_v8 }
 0x34b   : > { %1756 = vst [vmem:[%s3065_s8 + $0x180] sm:$0xff] %v1755_v26 }
 0x34c   : > { %1758 = vst [vmem:[%s3065_s8 + $0x190] sm:$0xff] %v1757_v29 }
 0x34d   : > { %1760 = vst [vmem:[%s3065_s8 + $0x1a0] sm:$0xff] %v1759_v11 }
 0x34e   : > { %1762 = vst [vmem:[%s3065_s8 + $0x1b0] sm:$0xff] %v1761_v12 }
 0x34f   : > { %1764 = vst [vmem:[%s3065_s8 + $0x1c0] sm:$0xff] %v1763_v30 }
 0x350   : > { %1766 = vst [vmem:[%s3065_s8 + $0x1d0] sm:$0xff] %v1765_v33 }
 0x351   : > { %1768 = vst [vmem:[%s3065_s8 + $0x1e0] sm:$0xff] %v1767_v15 }
 0x352   : > { %1770 = vst [vmem:[%s3065_s8 + $0x1f0] sm:$0xff] %v1769_v16 }
 0x353 PF: > { %s15_s28 = sadd.s32 1, %s2546_s28   ;;  %s3181_s25 = sld [smem:[#allocation11_spill]] }
 0x354   : > { %p12_p1 = scmp.ge.s32.totalorder %s15_s28, 10   ;;  %s3182_s11 = sld [smem:[#allocation10_spill]] }
 0x355   : > { %s3183_s24 = sld [smem:[#allocation7_spill]]  ;;  %s3186_s18 = smov %s2510_s19 }
 0x356   : > { %s3184_s26 = sld [smem:[#allocation8_spill]]  ;;  %s3187_s19 = smov %s2686_s13 }
 0x357   : > { %s3185_s16 = sld [smem:[#allocation9_spill]]  ;;  %s3188_s20 = smov %s2518_s21 }
 0x358   : > { %s3190_s22 = smov %s2526_s23 }
 0x359   : > { %s3189_s21 = smov %s3181_s25  ;;  %s3192_s25 = smov %s2542_s27 }
 0x35a   : > { %s3191_s23 = smov %s3182_s11  ;;  %14 = sbr.rel (!%p12_p1) target bundleno = 8 (0x8), region = 225 }
 0x35d   : > { %s3193_s27 = smov %s3185_s16 }

</bundles_post_ra>
